<compile_context>
chip_gen: v7x
topology: tpu7x:2x2x1
jax: 0.10.0
libtpu: 0.0.40
codegen_flags: <defaults>
</compile_context>

<pallas_src>
import jax
import jax.numpy as jnp
from jax import lax
from jax.experimental import pallas as pl
from jax.experimental.pallas import tpu as pltpu


# ---------------------------------------------------------------------------
# Kernel
# ---------------------------------------------------------------------------
def _sfe_kernel(x_ref, wconv_ref, bconv_ref, wl_ref, bl_ref, o_ref):
    # x_ref:     (B, L, C)   f32 activations (B samples per grid step)
    # wconv_ref: (3, 3C, C)  BN-scale-folded conv weights, taps fused on rows
    # bconv_ref: (3, 1, C)   BN-folded per-channel biases
    # wl_ref:    (4C, OUT_pad), bl_ref: (1, OUT_pad)
    # o_ref:     (B, OUT_pad)
    B, L, C = x_ref.shape
    R = B * L

    y = x_ref[...].reshape(R, C)                      # stack samples on rows

    # Row masks for the +/-1 shifts; also zero-pad at sample boundaries.
    row = lax.broadcasted_iota(jnp.int32, (R, C), 0)
    pos = row % L
    first_row = pos == 0
    last_row = pos == (L - 1)

    for i in range(3):                                # static unrolled layers
        ym1 = jnp.where(first_row, 0.0, pltpu.roll(y, shift=1, axis=0))
        yp1 = jnp.where(last_row, 0.0, pltpu.roll(y, shift=R - 1, axis=0))
        y3 = jnp.concatenate([ym1, y, yp1], axis=1)   # (R, 3C)
        y = jnp.dot(y3, wconv_ref[i], preferred_element_type=jnp.float32)
        y = jnp.maximum(y + bconv_ref[i], 0.0)        # BN bias + ReLU

    # AdaptiveMaxPool1d(4): per-sample max over 4 contiguous segments.
    y3d = y.reshape(B, L, C)
    segs = []
    for p in range(4):                                # static unrolled
        start = (p * L) // 4                          # floor(p*L/4)
        end = -((-(p + 1) * L) // 4)                  # ceil((p+1)*L/4)
        segs.append(jnp.max(y3d[:, start:end, :], axis=1))    # (B, C)
    pooled = jnp.concatenate(segs, axis=1)            # (B, 4C)

    # Linear (+ padded-out lanes) and final ReLU; lane-dense store.
    out = jnp.dot(pooled, wl_ref[...], preferred_element_type=jnp.float32)
    o_ref[...] = jnp.maximum(out + bl_ref[...], 0.0)


# ---------------------------------------------------------------------------
# Wrapper (layout transpose, BN folding, tap fusion, weight permutation)
# ---------------------------------------------------------------------------
def specific_feature_extractor(x_ncl, params, *, block_b=8):
    N, C, L = x_ncl.shape
    assert L >= 4, "AdaptiveMaxPool1d(4) needs L >= 4"
    OUT = params['b_lin'].shape[0]
    OUT_pad = pl.cdiv(OUT, 128) * 128
    eps = 1e-5

    # NCL -> NLC (length on sublanes, channels on lanes), pad batch to B mult.
    x_nlc = jnp.transpose(x_ncl, (0, 2, 1)).astype(jnp.float32)   # (N, L, C)
    B = block_b
    n_pad = pl.cdiv(N, B) * B
    if n_pad != N:
        x_nlc = jnp.pad(x_nlc, ((0, n_pad - N), (0, 0), (0, 0)))

    # Fold BN scale into the conv weights, fuse the 3 taps along contraction.
    wconv_list, bconv_list = [], []
    for i in (1, 2, 3):
        w = params[f'w_conv{i}'].astype(jnp.float32)              # (Cout,Cin,3)
        scale = (params[f'gamma{i}'] /
                 jnp.sqrt(params[f'var{i}'] + eps)).astype(jnp.float32)
        bias = (params[f'beta{i}'] +
                scale * (params[f'b_conv{i}'] - params[f'mean{i}'])
                ).astype(jnp.float32)
        # taps ordered [l-1, l, l+1] along rows; BN scale folded into Cout
        w_taps = jnp.transpose(w, (2, 1, 0)) * scale[None, None, :]  # (3,Cin,Cout)
        wconv_list.append(w_taps.reshape(3 * C, C))
        bconv_list.append(bias.reshape(1, C))
    wconv = jnp.stack(wconv_list, axis=0)                         # (3, 3C, C)
    bconv = jnp.stack(bconv_list, axis=0)                         # (3, 1, C)

    # PyTorch Flatten on (N, C, 4) gives index c*4 + p; reorder Linear weight
    # (out, 4*C) -> (4C, out) matching the kernel's [seg0|seg1|seg2|seg3] lane
    # order (index p*C + c); zero-pad the output dim to a 128-lane multiple.
    w_lin = params['w_lin'].astype(jnp.float32)                   # (OUT, 4C)
    wl = jnp.transpose(w_lin.reshape(OUT, C, 4), (2, 1, 0)).reshape(4 * C, OUT)
    bl = params['b_lin'].astype(jnp.float32).reshape(1, OUT)
    if OUT_pad != OUT:
        wl = jnp.pad(wl, ((0, 0), (0, OUT_pad - OUT)))
        bl = jnp.pad(bl, ((0, 0), (0, OUT_pad - OUT)))

    grid = (n_pad // B,)
    in_specs = [
        pl.BlockSpec((B, L, C), lambda n: (n, 0, 0)),
        pl.BlockSpec(wconv.shape, lambda n: (0, 0, 0)),
        pl.BlockSpec(bconv.shape, lambda n: (0, 0, 0)),
        pl.BlockSpec(wl.shape, lambda n: (0, 0)),
        pl.BlockSpec(bl.shape, lambda n: (0, 0)),
    ]

    out = pl.pallas_call(
        _sfe_kernel,
        out_shape=jax.ShapeDtypeStruct((n_pad, OUT_pad), jnp.float32),
        grid=grid,
        in_specs=in_specs,
        out_specs=pl.BlockSpec((B, OUT_pad), lambda n: (n, 0)),
        compiler_params=pltpu.CompilerParams(
            dimension_semantics=("parallel",)),
    )(x_nlc, wconv, bconv, wl, bl)
    return out[:N, :OUT]


# ---------------------------------------------------------------------------
# Pure-JAX reference (mirrors the PyTorch module, eval-mode BN)
# ---------------------------------------------------------------------------
def reference(x_ncl, params):
    eps = 1e-5
    y = x_ncl.astype(jnp.float32)
    for i in (1, 2, 3):
        w = params[f'w_conv{i}'].astype(jnp.float32)
        y = lax.conv_general_dilated(y, w, (1,), ((1, 1),),
                                     dimension_numbers=('NCH', 'OIH', 'NCH'))
        y = y + params[f'b_conv{i}'].reshape(1, -1, 1)
        scale = params[f'gamma{i}'] / jnp.sqrt(params[f'var{i}'] + eps)
        y = (scale.reshape(1, -1, 1) * (y - params[f'mean{i}'].reshape(1, -1, 1))
             + params[f'beta{i}'].reshape(1, -1, 1))
        y = jnp.maximum(y, 0.0)
    N, C, L = y.shape
    segs = []
    for p in range(4):
        start = (p * L) // 4
        end = -((-(p + 1) * L) // 4)
        segs.append(jnp.max(y[:, :, start:end], axis=-1))
    pooled = jnp.stack(segs, axis=-1)                 # (N, C, 4)
    flat = pooled.reshape(N, C * 4)
    out = flat @ params['w_lin'].T + params['b_lin']
    return jnp.maximum(out, 0.0)


# ---------------------------------------------------------------------------
if __name__ == "__main__":
    # Small shapes consistent with the module; N=10 exercises batch padding
    # and gives 2 grid steps (both TCs busy on v7x).
    N, C, L, OUT = 10, 32, 16, 32
    key = jax.random.PRNGKey(0)
    keys = jax.random.split(key, 24)

    x = jax.random.normal(keys[0], (N, C, L), jnp.float32)

    params = {}
    k = 1
    for i in (1, 2, 3):
        params[f'w_conv{i}'] = 0.1 * jax.random.normal(keys[k], (C, C, 3)); k += 1
        params[f'b_conv{i}'] = 0.1 * jax.random.normal(keys[k], (C,));      k += 1
        params[f'gamma{i}']  = 0.5 + jax.random.uniform(keys[k], (C,));     k += 1
        params[f'beta{i}']   = 0.1 * jax.random.normal(keys[k], (C,));      k += 1
        params[f'mean{i}']   = 0.1 * jax.random.normal(keys[k], (C,));      k += 1
        params[f'var{i}']    = 0.5 + jax.random.uniform(keys[k], (C,));     k += 1
    params['w_lin'] = 0.1 * jax.random.normal(keys[k], (OUT, 4 * C)); k += 1
    params['b_lin'] = 0.1 * jax.random.normal(keys[k], (OUT,));       k += 1

    out = jax.block_until_ready(specific_feature_extractor(x, params))
    ref = reference(x, params)

    assert out.shape == (N, OUT), out.shape
    assert jnp.allclose(out, ref, atol=1e-3, rtol=1e-3), \
        f"max abs diff {jnp.max(jnp.abs(out - ref))}"
    print("KERNEL_OK")
</pallas_src>

<mosaic_0001>
module attributes {stable_mosaic.version = 11 : i64} {
  func.func @_sfe_kernel(%arg0: i32, %arg1: memref<8x16x32xf32, #tpu.memory_space<vmem>>, %arg2: memref<3x96x32xf32, #tpu.memory_space<vmem>>, %arg3: memref<3x1x32xf32, #tpu.memory_space<vmem>>, %arg4: memref<128x128xf32, #tpu.memory_space<vmem>>, %arg5: memref<1x128xf32, #tpu.memory_space<vmem>>, %arg6: memref<8x128xf32, #tpu.memory_space<vmem>>) attributes {dimension_semantics = [#tpu.dimension_semantics<parallel>], iteration_bounds = array<i64: 2>, scalar_prefetch = 0 : i64, scratch_operands = 0 : i64, tpu.core_type = #tpu.core_type<tc>, window_params = [{transform_indices = @transform_0, window_bounds = array<i64: 8, 16, 32>}, {pipeline_mode = #tpu.pipeline_mode<synchronous>, transform_indices = @transform_1, window_bounds = array<i64: 3, 96, 32>}, {pipeline_mode = #tpu.pipeline_mode<synchronous>, transform_indices = @transform_2, window_bounds = array<i64: 3, 1, 32>}, {pipeline_mode = #tpu.pipeline_mode<synchronous>, transform_indices = @transform_3, window_bounds = array<i64: 128, 128>}, {pipeline_mode = #tpu.pipeline_mode<synchronous>, transform_indices = @transform_4, window_bounds = array<i64: 1, 128>}, {transform_indices = @transform_5, window_bounds = array<i64: 8, 128>}]} {
    %c0 = arith.constant 0 : index
    %c0_0 = arith.constant 0 : index
    %c0_1 = arith.constant 0 : index
    %0 = vector.load %arg1[%c0, %c0_0, %c0_1] : memref<8x16x32xf32, #tpu.memory_space<vmem>>, vector<8x16x32xf32>
    %1 = vector.shape_cast %0 : vector<8x16x32xf32> to vector<128x32xf32>
    %2 = tpu.iota {dimensions = array<i32: 0>} : vector<128x32xi32>
    %c16_i32 = arith.constant 16 : i32
    %c0_i32 = arith.constant 0 : i32
    %3 = arith.cmpi eq, %c16_i32, %c0_i32 : i32
    %c1_i32 = arith.constant 1 : i32
    %4 = arith.select %3, %c1_i32, %c16_i32 : i32
    %5 = vector.broadcast %4 : i32 to vector<128x32xi32>
    %6 = arith.remsi %2, %5 : vector<128x32xi32>
    %c0_i32_2 = arith.constant 0 : i32
    %7 = vector.broadcast %c0_i32_2 : i32 to vector<128x32xi32>
    %8 = arith.cmpi ne, %6, %7 : vector<128x32xi32>
    %c0_i32_3 = arith.constant 0 : i32
    %9 = vector.broadcast %c0_i32_3 : i32 to vector<128x32xi32>
    %10 = arith.cmpi slt, %6, %9 : vector<128x32xi32>
    %c0_i32_4 = arith.constant 0 : i32
    %11 = arith.cmpi slt, %4, %c0_i32_4 : i32
    %12 = vector.broadcast %11 : i1 to vector<128x32xi1>
    %13 = vector.broadcast %12 : vector<128x32xi1> to vector<128x32xi1>
    %14 = arith.xori %10, %13 : vector<128x32xi1>
    %15 = arith.andi %14, %8 : vector<128x32xi1>
    %16 = vector.broadcast %4 : i32 to vector<128x32xi32>
    %17 = arith.addi %6, %16 : vector<128x32xi32>
    %18 = arith.select %15, %17, %6 : vector<128x32xi1>, vector<128x32xi32>
    %c0_i32_5 = arith.constant 0 : i32
    %19 = vector.broadcast %c0_i32_5 : i32 to vector<128x32xi32>
    %20 = arith.cmpi eq, %18, %19 : vector<128x32xi32>
    %c15_i32 = arith.constant 15 : i32
    %21 = vector.broadcast %c15_i32 : i32 to vector<128x32xi32>
    %22 = arith.cmpi eq, %18, %21 : vector<128x32xi32>
    %c1_i32_6 = arith.constant 1 : i32
    %23 = tpu.dynamic_rotate %1 by %c1_i32_6 dim 0 : vector<128x32xf32>, i32 -> vector<128x32xf32>
    %cst = arith.constant 0.000000e+00 : f32
    %24 = vector.broadcast %cst : f32 to vector<128x32xf32>
    %25 = arith.select %20, %24, %23 : vector<128x32xi1>, vector<128x32xf32>
    %c127_i32 = arith.constant 127 : i32
    %26 = tpu.dynamic_rotate %1 by %c127_i32 dim 0 : vector<128x32xf32>, i32 -> vector<128x32xf32>
    %cst_7 = arith.constant 0.000000e+00 : f32
    %27 = vector.broadcast %cst_7 : f32 to vector<128x32xf32>
    %28 = arith.select %22, %27, %26 : vector<128x32xi1>, vector<128x32xf32>
    %29 = tpu.concatenate %25, %1, %28 in 1 : vector<128x32xf32>, vector<128x32xf32>, vector<128x32xf32> -> vector<128x96xf32>
    %c0_8 = arith.constant 0 : index
    %c0_9 = arith.constant 0 : index
    %c0_10 = arith.constant 0 : index
    %30 = vector.load %arg2[%c0_8, %c0_9, %c0_10] : memref<3x96x32xf32, #tpu.memory_space<vmem>>, vector<1x96x32xf32>
    %31 = vector.shape_cast %30 : vector<1x96x32xf32> to vector<96x32xf32>
    %cst_11 = arith.constant dense<0.000000e+00> : vector<128x32xf32>
    %32 = tpu.matmul %29, %31, %cst_11 {dimension_numbers = #tpu.dot_dimension_numbers<[1], [0], [0], [1], [0, 0, 1, 1], [], []>} : vector<128x96xf32>, vector<96x32xf32>, vector<128x32xf32> -> vector<128x32xf32>
    %c0_12 = arith.constant 0 : index
    %c0_13 = arith.constant 0 : index
    %c0_14 = arith.constant 0 : index
    %33 = vector.load %arg3[%c0_12, %c0_13, %c0_14] : memref<3x1x32xf32, #tpu.memory_space<vmem>>, vector<1x1x32xf32>
    %34 = vector.shape_cast %33 : vector<1x1x32xf32> to vector<1x32xf32>
    %35 = vector.broadcast %34 : vector<1x32xf32> to vector<128x32xf32>
    %36 = arith.addf %32, %35 : vector<128x32xf32>
    %cst_15 = arith.constant 0.000000e+00 : f32
    %37 = vector.broadcast %cst_15 : f32 to vector<128x32xf32>
    %38 = arith.maximumf %36, %37 : vector<128x32xf32>
    %c1_i32_16 = arith.constant 1 : i32
    %39 = tpu.dynamic_rotate %38 by %c1_i32_16 dim 0 : vector<128x32xf32>, i32 -> vector<128x32xf32>
    %cst_17 = arith.constant 0.000000e+00 : f32
    %40 = vector.broadcast %cst_17 : f32 to vector<128x32xf32>
    %41 = arith.select %20, %40, %39 : vector<128x32xi1>, vector<128x32xf32>
    %c127_i32_18 = arith.constant 127 : i32
    %42 = tpu.dynamic_rotate %38 by %c127_i32_18 dim 0 : vector<128x32xf32>, i32 -> vector<128x32xf32>
    %cst_19 = arith.constant 0.000000e+00 : f32
    %43 = vector.broadcast %cst_19 : f32 to vector<128x32xf32>
    %44 = arith.select %22, %43, %42 : vector<128x32xi1>, vector<128x32xf32>
    %45 = tpu.concatenate %41, %38, %44 in 1 : vector<128x32xf32>, vector<128x32xf32>, vector<128x32xf32> -> vector<128x96xf32>
    %c1 = arith.constant 1 : index
    %c0_20 = arith.constant 0 : index
    %c0_21 = arith.constant 0 : index
    %46 = vector.load %arg2[%c1, %c0_20, %c0_21] : memref<3x96x32xf32, #tpu.memory_space<vmem>>, vector<1x96x32xf32>
    %47 = vector.shape_cast %46 : vector<1x96x32xf32> to vector<96x32xf32>
    %cst_22 = arith.constant dense<0.000000e+00> : vector<128x32xf32>
    %48 = tpu.matmul %45, %47, %cst_22 {dimension_numbers = #tpu.dot_dimension_numbers<[1], [0], [0], [1], [0, 0, 1, 1], [], []>} : vector<128x96xf32>, vector<96x32xf32>, vector<128x32xf32> -> vector<128x32xf32>
    %c1_23 = arith.constant 1 : index
    %c0_24 = arith.constant 0 : index
    %c0_25 = arith.constant 0 : index
    %49 = vector.load %arg3[%c1_23, %c0_24, %c0_25] : memref<3x1x32xf32, #tpu.memory_space<vmem>>, vector<1x1x32xf32>
    %50 = vector.shape_cast %49 : vector<1x1x32xf32> to vector<1x32xf32>
    %51 = vector.broadcast %50 : vector<1x32xf32> to vector<128x32xf32>
    %52 = arith.addf %48, %51 : vector<128x32xf32>
    %cst_26 = arith.constant 0.000000e+00 : f32
    %53 = vector.broadcast %cst_26 : f32 to vector<128x32xf32>
    %54 = arith.maximumf %52, %53 : vector<128x32xf32>
    %c1_i32_27 = arith.constant 1 : i32
    %55 = tpu.dynamic_rotate %54 by %c1_i32_27 dim 0 : vector<128x32xf32>, i32 -> vector<128x32xf32>
    %cst_28 = arith.constant 0.000000e+00 : f32
    %56 = vector.broadcast %cst_28 : f32 to vector<128x32xf32>
    %57 = arith.select %20, %56, %55 : vector<128x32xi1>, vector<128x32xf32>
    %c127_i32_29 = arith.constant 127 : i32
    %58 = tpu.dynamic_rotate %54 by %c127_i32_29 dim 0 : vector<128x32xf32>, i32 -> vector<128x32xf32>
    %cst_30 = arith.constant 0.000000e+00 : f32
    %59 = vector.broadcast %cst_30 : f32 to vector<128x32xf32>
    %60 = arith.select %22, %59, %58 : vector<128x32xi1>, vector<128x32xf32>
    %61 = tpu.concatenate %57, %54, %60 in 1 : vector<128x32xf32>, vector<128x32xf32>, vector<128x32xf32> -> vector<128x96xf32>
    %c2 = arith.constant 2 : index
    %c0_31 = arith.constant 0 : index
    %c0_32 = arith.constant 0 : index
    %62 = vector.load %arg2[%c2, %c0_31, %c0_32] : memref<3x96x32xf32, #tpu.memory_space<vmem>>, vector<1x96x32xf32>
    %63 = vector.shape_cast %62 : vector<1x96x32xf32> to vector<96x32xf32>
    %cst_33 = arith.constant dense<0.000000e+00> : vector<128x32xf32>
    %64 = tpu.matmul %61, %63, %cst_33 {dimension_numbers = #tpu.dot_dimension_numbers<[1], [0], [0], [1], [0, 0, 1, 1], [], []>} : vector<128x96xf32>, vector<96x32xf32>, vector<128x32xf32> -> vector<128x32xf32>
    %c2_34 = arith.constant 2 : index
    %c0_35 = arith.constant 0 : index
    %c0_36 = arith.constant 0 : index
    %65 = vector.load %arg3[%c2_34, %c0_35, %c0_36] : memref<3x1x32xf32, #tpu.memory_space<vmem>>, vector<1x1x32xf32>
    %66 = vector.shape_cast %65 : vector<1x1x32xf32> to vector<1x32xf32>
    %67 = vector.broadcast %66 : vector<1x32xf32> to vector<128x32xf32>
    %68 = arith.addf %64, %67 : vector<128x32xf32>
    %cst_37 = arith.constant 0.000000e+00 : f32
    %69 = vector.broadcast %cst_37 : f32 to vector<128x32xf32>
    %70 = arith.maximumf %68, %69 : vector<128x32xf32>
    %71 = vector.shape_cast %70 : vector<128x32xf32> to vector<8x16x32xf32>
    %72 = vector.extract_strided_slice %71 {offsets = [0, 0, 0], sizes = [8, 4, 32], strides = [1, 1, 1]} : vector<8x16x32xf32> to vector<8x4x32xf32>
    %cst_38 = arith.constant dense<0xFF800000> : vector<8x32xf32>
    %73 = vector.multi_reduction <maximumf>, %72, %cst_38 [1] : vector<8x4x32xf32> to vector<8x32xf32>
    %74 = vector.extract_strided_slice %71 {offsets = [0, 4, 0], sizes = [8, 4, 32], strides = [1, 1, 1]} : vector<8x16x32xf32> to vector<8x4x32xf32>
    %cst_39 = arith.constant dense<0xFF800000> : vector<8x32xf32>
    %75 = vector.multi_reduction <maximumf>, %74, %cst_39 [1] : vector<8x4x32xf32> to vector<8x32xf32>
    %76 = vector.extract_strided_slice %71 {offsets = [0, 8, 0], sizes = [8, 4, 32], strides = [1, 1, 1]} : vector<8x16x32xf32> to vector<8x4x32xf32>
    %cst_40 = arith.constant dense<0xFF800000> : vector<8x32xf32>
    %77 = vector.multi_reduction <maximumf>, %76, %cst_40 [1] : vector<8x4x32xf32> to vector<8x32xf32>
    %78 = vector.extract_strided_slice %71 {offsets = [0, 12, 0], sizes = [8, 4, 32], strides = [1, 1, 1]} : vector<8x16x32xf32> to vector<8x4x32xf32>
    %cst_41 = arith.constant dense<0xFF800000> : vector<8x32xf32>
    %79 = vector.multi_reduction <maximumf>, %78, %cst_41 [1] : vector<8x4x32xf32> to vector<8x32xf32>
    %80 = tpu.concatenate %73, %75, %77, %79 in 1 : vector<8x32xf32>, vector<8x32xf32>, vector<8x32xf32>, vector<8x32xf32> -> vector<8x128xf32>
    %c0_42 = arith.constant 0 : index
    %c0_43 = arith.constant 0 : index
    %81 = vector.load %arg4[%c0_42, %c0_43] : memref<128x128xf32, #tpu.memory_space<vmem>>, vector<128x128xf32>
    %cst_44 = arith.constant dense<0.000000e+00> : vector<8x128xf32>
    %82 = tpu.matmul %80, %81, %cst_44 {dimension_numbers = #tpu.dot_dimension_numbers<[1], [0], [0], [1], [0, 0, 1, 1], [], []>} : vector<8x128xf32>, vector<128x128xf32>, vector<8x128xf32> -> vector<8x128xf32>
    %c0_45 = arith.constant 0 : index
    %c0_46 = arith.constant 0 : index
    %83 = vector.load %arg5[%c0_45, %c0_46] : memref<1x128xf32, #tpu.memory_space<vmem>>, vector<1x128xf32>
    %84 = vector.broadcast %83 : vector<1x128xf32> to vector<8x128xf32>
    %85 = arith.addf %82, %84 : vector<8x128xf32>
    %cst_47 = arith.constant 0.000000e+00 : f32
    %86 = vector.broadcast %cst_47 : f32 to vector<8x128xf32>
    %87 = arith.maximumf %85, %86 : vector<8x128xf32>
    %c0_48 = arith.constant 0 : index
    %c0_49 = arith.constant 0 : index
    %88 = vector.load %arg6[%c0_48, %c0_49] : memref<8x128xf32, #tpu.memory_space<vmem>>, vector<8x128xf32>
    tpu.vector_store %arg6[%c0_48, %c0_49], %87 {strides = array<i32>} : memref<8x128xf32, #tpu.memory_space<vmem>>, vector<8x128xf32>,
    return
  }
  func.func @transform_0(%arg0: i32) -> (i32, i32, i32) {
    %c0_i32 = arith.constant 0 : i32
    %c0_i32_0 = arith.constant 0 : i32
    %c0_i32_1 = arith.constant 0 : i32
    return %arg0, %c0_i32, %c0_i32_0 : i32, i32, i32
  }
  func.func @transform_1(%arg0: i32) -> (i32, i32, i32) {
    %c0_i32 = arith.constant 0 : i32
    %c0_i32_0 = arith.constant 0 : i32
    %c0_i32_1 = arith.constant 0 : i32
    %c0_i32_2 = arith.constant 0 : i32
    return %c0_i32, %c0_i32_0, %c0_i32_1 : i32, i32, i32
  }
  func.func @transform_2(%arg0: i32) -> (i32, i32, i32) {
    %c0_i32 = arith.constant 0 : i32
    %c0_i32_0 = arith.constant 0 : i32
    %c0_i32_1 = arith.constant 0 : i32
    %c0_i32_2 = arith.constant 0 : i32
    return %c0_i32, %c0_i32_0, %c0_i32_1 : i32, i32, i32
  }
  func.func @transform_3(%arg0: i32) -> (i32, i32) {
    %c0_i32 = arith.constant 0 : i32
    %c0_i32_0 = arith.constant 0 : i32
    %c0_i32_1 = arith.constant 0 : i32
    return %c0_i32, %c0_i32_0 : i32, i32
  }
  func.func @transform_4(%arg0: i32) -> (i32, i32) {
    %c0_i32 = arith.constant 0 : i32
    %c0_i32_0 = arith.constant 0 : i32
    %c0_i32_1 = arith.constant 0 : i32
    return %c0_i32, %c0_i32_0 : i32, i32
  }
  func.func @transform_5(%arg0: i32) -> (i32, i32) {
    %c0_i32 = arith.constant 0 : i32
    %c0_i32_0 = arith.constant 0 : i32
    return %arg0, %c0_i32 : i32, i32
  }
}

</mosaic_0001>

<bundles_post_ra>
// kernel: tpu_custom_call.1
= control target key start
LH: loop header
LB: loop body
LE: loop exit
PB: predicated region body
PF: predicated region fallthrough
CT: control target
= control target key end

     0   :  { %10 = vsyncpa [#allocation3], 0  ;;  %s4400_s0 = inlined_call_operand.vmem [shape: f32[16,16,32], index: 0, kind: input, shape index: {}]   ;;  %s4401_s1 = inlined_call_operand.vmem [shape: f32[3,96,32], index: 1, kind: input, shape index: {}]   ;;  %s4402_s2 = inlined_call_operand.vmem [shape: f32[3,1,32], index: 2, kind: input, shape index: {}]   ;;  %s4403_s3 = inlined_call_operand.vmem [shape: f32[128,128], index: 3, kind: input, shape index: {}]   ;;  %s4404_s4 = inlined_call_operand.vmem [shape: f32[1,128], index: 4, kind: input, shape index: {}]   ;;  %s4405_s5 = inlined_call_operand.hbm [shape: f32[16,128], index: 5, kind: output, shape index: {}]  }
   0x1   :  { %12 = vsyncpa [#allocation3 + $0x1], 0  ;;  %s3045_s18 = smov 0   ;;  %s3047_s19 = smov 0  }
   0x2   :  { %s3049_s20 = smov 0   ;;  %s3051_s21 = smov 0  }
   0x3 LB: > { %s3066_s22 = sadd.s32 4294967295, %s3006_s21   ;;  %s2420_s23 = sadd.s32 4294967294, %s3006_s21   ;;  %s3006_s21 = sphi %s3051_s21, %s4636_s21   ;;  %s3002_s20 = sphi %s3049_s20, %s4635_s20   ;;  %s2998_s19 = sphi %s3047_s19, %s4634_s19   ;;  %s2994_s18 = sphi %s3045_s18, %s4633_s18  }
   0x4   : > { %s3070_s24 = sadd.s32 1, %s3006_s21   ;;  %s135_s25 = sadd.s32 1, %s3002_s20 }
   0x5   : > { %s132_s26 = ssub.s32 %s3006_s21, %s3070_s24  ;;  %p145_p0 = scmp.ne.s32.totalorder %s3002_s20, %s2998_s19 }
   0x6   : > { %p133_p1 = scmp.eq.s32.totalorder %s132_s26, 0  ;;  %p146_p2 = scmp.eq.s32.totalorder %s3066_s22, 1 }
   0x7   : > { %p151_p3 = scmp.ne.s32.totalorder %s2998_s19, %s2994_s18  ;;  %p152_p4 = scmp.eq.s32.totalorder %s2420_s23, 1 }
   0x8   : > { %s3081_s27 = scalar_select %p133_p1, %s3002_s20, %s135_s25  }
   0x9   : > { %p3083_p5 = por %p146_p2, %p145_p0  ;;  %p3087_p6 = por %p152_p4, %p151_p3 }
   0xa   : > { %p2423_p7 = scmp.ge.s32.totalorder %s3006_s21, 1  ;;  %p192_p8 = scmp.lt.s32.totalorder %s3006_s21, 3 }
   0xc   : > { %p193_p9 = pnand %p2423_p7, %p192_p8 }
   0xe   : > { %196 = sbr.rel (%p193_p9) target bundleno = 1536 (0x600), region = 40 }
  0x15   : > { %s2425_s30 = sshll.u32 %s3066_s22, 3  ;;  %v244_v0 = vlaneseq  ;;  %v745_v1 = vld [vmem:[%s4401_s1] sm:$0xff]  ;;  %v746_v2 = vld [vmem:[%s4401_s1 + $0x8] sm:$0xff]  ;;  %v747_v3 = vld [vmem:[%s4401_s1 + $0x10] sm:$0xff]  ;;  %s3008_s10 = smov 32   ;;  %vm4420_vm11 = vcmask 261120  }
  0x16   : > { %p222_p10 = scmp.lt.s32.totalorder %s2425_s30, 15  ;;  %v2791_v4 = vpack.c.bf16 %v746_v2, %v745_v1  ;;  %v748_v5 = vld [vmem:[%s4401_s1 + $0x18] sm:$0xff]  ;;  %v749_v8 = vld [vmem:[%s4401_s1 + $0x20] sm:$0xff]  ;;  %v750_v9 = vld [vmem:[%s4401_s1 + $0x28] sm:$0xff]  ;;  %s3009_s15 = smov 64   ;;  %vm4412_vm12 = vcmask 523264  }
  0x17   : > { %v3106_v6 = vshrl.u32 %v244_v0, 7  ;;  %v2795_v7 = vpack.c.bf16 %v748_v5, %v747_v3  ;;  %v2799_v13 = vpack.c.bf16 %v750_v9, %v749_v8  ;;  %v751_v14 = vld [vmem:[%s4401_s1 + $0x30] sm:$0xff]  ;;  %v752_v15 = vld [vmem:[%s4401_s1 + $0x38] sm:$0xff]  ;;  %v753_v31 = vld [vmem:[%s4401_s1 + $0x40] sm:$0xff]  ;;  %vm4415_vm13 = vcmask 785408   ;;  %s218_s7 = sand.u32 1, %s2998_s19  }
  0x18   : > { %s4638_s30 = smov (!%p222_p10, %s2425_s30), 15  ;;  %2792 = vmatprep.subr.bf16.mxu0 %v2791_v4  ;;  %2887 = vmatprep.subr.bf16.mxu1 %v2791_v4  ;;  %v2803_v24 = vpack.c.bf16 %v752_v15, %v751_v14  ;;  %v754_v32 = vld [vmem:[%s4401_s1 + $0x48] sm:$0xff]  ;;  %v755_v49 = vld [vmem:[%s4401_s1 + $0x50] sm:$0xff]  ;;  %v756_v50 = vld [vmem:[%s4401_s1 + $0x58] sm:$0xff]  ;;  %s2424_s8 = sshll.u32 %s218_s7, 3 }
  0x19   : > { %v246_v10 = vadd.s32 8, %v3106_v6  ;;  %2794 = vmatpush3.bf16.msra.mxu0 %v2791_v4  ;;  %2893 = vmatpush3.bf16.msra.mxu1 %v2791_v4  ;;  %s2510_s23 = sshll.u32 %s4638_s30, 4  ;;  %v248_v12 = vadd.s32 24, %v3106_v6  ;;  %vm4406_vm0 = vcmp.lt.s32.totalorder %v3106_v6, 7  ;;  %v250_v34 = vadd.s32 40, %v3106_v6  ;;  %s220_s11 = scalar_lea.vmem [#allocation2], %s2424_s8 }
  0x1a   : > { %2796 = vmatprep.subr.bf16.mxu0 %v2795_v7  ;;  %2888 = vmatprep.subr.bf16.mxu1 %v2795_v7  ;;  %s3118_s6 = scalar_lea.vmem %s4400_s0, %s2510_s23  ;;  %v2807_v37 = vpack.c.bf16 %v754_v32, %v753_v31  ;;  %vm4407_vm3 = vcmp.lt.s32.totalorder %v3106_v6, 1  ;;  %v252_v53 = vadd.s32 56, %v3106_v6  ;;  %v2811_v60 = vpack.c.bf16 %v756_v50, %v755_v49  ;;  %s2361_s12 = sshll.u32 %s220_s11, 4  ;;  %s4360_s12 = int_to_ptr.vmem [resolvable:$true] %s2361_s12 }
  0x1b   : > { %v272_v11 = vand.u32 15, %v246_v10  ;;  %v3128_v16 = vld [vmem:[%s3118_s6 + $0x18] sm:$0xff]  ;;  %v3131_v17 = vld [vmem:[%s3118_s6] sm:$0xff]  ;;  %v3134_v18 = vld [vmem:[%s3118_s6 + $0x8] sm:$0xff]  ;;  %v286_v27 = vand.u32 15, %v248_v12  ;;  %v300_v42 = vand.u32 15, %v250_v34 }
  0x1c   : > { %605 = vrot.lane.b32.xlu1 %v3128_v16, %s3008_s10  ;;  %599 = vrot.lane.b32.xlu0 %v3131_v17, %s3008_s10  ;;  %v534_v19 = vrot.slane %v3131_v17, 1  ;;  %v3143_v20 = vld [vmem:[%s3118_s6 + $0x10] sm:$0xff]  ;;  %v3146_v21 = vld [vmem:[%s3118_s6 + $0x20] sm:$0xff]  ;;  %v535_v22 = vrot.slane %v3134_v18, 1  ;;  %v537_v25 = vrot.slane %v3128_v16, 1  ;;  %v488_v43 = vrot.slane %v3128_v16, 7 }
  0x1d   : > { %v536_v23 = vrot.slane %v3143_v20, 1  ;;  %2798 = vmatpush3.bf16.msra.mxu0 %v2795_v7  ;;  %2894 = vmatpush3.bf16.msra.mxu1 %v2795_v7  ;;  %vm3151_vm1 = vcmp.eq.s32.totalorder %v272_v11, 15  ;;  %v538_v28 = vrot.slane %v3146_v21, 1  ;;  %vm3174_vm2 = vcmp.eq.s32.totalorder %v286_v27, 15  ;;  %v233_v38 = vld [vmem:[%s3118_s6 + $0x28] sm:$0xff]  ;;  %v3182_v39 = vld [vmem:[%s3118_s6 + $0x30] sm:$0xff] }
  0x1e   : > { %2800 = vmatprep.subr.bf16.mxu0 %v2799_v13  ;;  %2889 = vmatprep.subr.bf16.mxu1 %v2799_v13  ;;  %v565_v29 = vsel %vm4406_vm0, %v534_v19, %v535_v22  ;;  %v487_v44 = vrot.slane %v3143_v20, 7  ;;  %v539_v45 = vrot.slane %v233_v38, 1  ;;  %v540_v46 = vrot.slane %v3182_v39, 1  ;;  %v235_v56 = vld [vmem:[%s3118_s6 + $0x38] sm:$0xff]  ;;  %v236_v57 = vld [vmem:[%s3118_s6 + $0x40] sm:$0xff]  ;;  %v237_v4 = vld [vmem:[%s3118_s6 + $0x48] sm:$0xff] }
  0x1f   : > { %v564_v30 = vsel %vm4406_vm0, %v535_v22, %v536_v23  ;;  %v562_v36 = vsel %vm4406_vm0, %v537_v25, %v538_v28  ;;  %v563_v40 = vsel %vm4406_vm0, %v536_v23, %v537_v25  ;;  %v486_v47 = vrot.slane %v3134_v18, 7  ;;  %v238_v15 = vld [vmem:[%s3118_s6 + $0x50] sm:$0xff]  ;;  %v240_v34 = vld [vmem:[%s3118_s6 + $0x60] sm:$0xff]  ;;  %s2348_s17 = scalar_lea.sflag [#allocation3], %s218_s7  ;;  %s2944_s23 = scalar_lea.vmem %s4360_s12, 128 }
  0x20   : > { %601 = vrot.lane.b32.xlu0 %v3134_v18, %s3008_s10  ;;  %663 = vrot.lane.b32.xlu1 %v565_v29, %s3009_s15  ;;  %v568_v33 = vsel %vm3151_vm1, 0.0, %v564_v30  ;;  %v570_v41 = vsel %vm3174_vm2, 0.0, %v562_v36  ;;  %v485_v48 = vrot.slane %v3131_v17, 7  ;;  %vm3205_vm4 = vcmp.eq.s32.totalorder %v300_v42, 15  ;;  %v239_v18 = vld [vmem:[%s3118_s6 + $0x58] sm:$0xff]  ;;  %p2945_p11 = scmp.ne.s32.totalorder %s4360_s12, %s2944_s23 }
  0x21   : > { %2802 = vmatpush3.bf16.msra.mxu0 %v2799_v13  ;;  %2895 = vmatpush3.bf16.msra.mxu1 %v2799_v13  ;;  %v560_v52 = vsel %vm4406_vm0, %v539_v45, %v540_v46  ;;  %v3214_v54 = vsel %vm4407_vm3, %v487_v44, %v488_v43  ;;  %v490_v55 = vrot.slane %v233_v38, 7  ;;  %v492_v59 = vrot.slane %v235_v56, 7 }
  0x22   : > { %2804 = vmatprep.subr.bf16.mxu0 %v2803_v24  ;;  %2890 = vmatprep.subr.bf16.mxu1 %v2803_v24  ;;  %v3222_v58 = vsel %vm4407_vm3, %v485_v48, %v486_v47  ;;  %v3229_v61 = vsel %vm4407_vm3, %v486_v47, %v487_v44  ;;  %v561_v62 = vsel %vm4406_vm0, %v538_v28, %v539_v45  ;;  %v572_v63 = vsel %vm3205_vm4, 0.0, %v560_v52  ;;  %v3323_v52 = vld [vmem:[%s3118_s6 + $0x70] sm:$0xff]  ;;  %p2946_p12 = pnand %p2945_p11, %p3083_p5 }
  0x23   : > { %v489_v0 = vrot.slane %v3146_v21, 7  ;;  %v541_v1 = vrot.slane %v235_v56, 1  ;;  %v314_v2 = vand.u32 15, %v252_v53  ;;  %v542_v3 = vrot.slane %v236_v57, 1 }
  0x24   : > { %603 = vrot.lane.b32.xlu0 %v3143_v20, %s3008_s10  ;;  %665 = vrot.lane.b32.xlu1 %v568_v33, %s3009_s15  ;;  %v491_v5 = vrot.slane %v3182_v39, 7  ;;  %v494_v7 = vrot.slane %v237_v4, 7  ;;  %v493_v12 = vrot.slane %v236_v57, 7  ;;  %v254_v16 = vadd.s32 72, %v3106_v6  ;;  %p2947_p13 = pneg %p2946_p12 }
  0x25   : > { %2806 = vmatpush3.bf16.msra.mxu0 %v2803_v24  ;;  %2896 = vmatpush3.bf16.msra.mxu1 %v2803_v24  ;;  %v3240_v8 = vsel %vm4407_vm3, %v488_v43, %v489_v0  ;;  %v3244_v9 = vsel %vm4407_vm3, %v489_v0, %v490_v55  ;;  %vm3256_vm5 = vcmp.eq.s32.totalorder %v314_v2, 15  ;;  %v558_v14 = vsel %vm4406_vm0, %v541_v1, %v542_v3  ;;  %v3349_v2 = vld [vmem:[%s3118_s6 + $0x78] sm:$0xff] }
  0x26   : > { %2808 = vmatprep.subr.bf16.mxu0 %v2807_v37  ;;  %2891 = vmatprep.subr.bf16.mxu1 %v2807_v37  ;;  %v3250_v10 = vsel %vm4407_vm3, %v490_v55, %v491_v5  ;;  %v3254_v11 = vsel %vm4407_vm3, %v491_v5, %v492_v59  ;;  %v496_v20 = vrot.slane %v239_v18, 7  ;;  %v3271_v22 = vsel %vm4407_vm3, %v493_v12, %v494_v7 }
  0x27   : > { %v495_v23 = vrot.slane %v238_v15, 7  ;;  %v559_v24 = vsel %vm4406_vm0, %v540_v46, %v541_v1  ;;  %v574_v25 = vsel %vm3256_vm5, 0.0, %v558_v14  ;;  %v543_v28 = vrot.slane %v237_v4, 1 }
  0x28   : > { %667 = vrot.lane.b32.xlu0 %v563_v40, %s3009_s15  ;;  %669 = vrot.lane.b32.xlu1 %v570_v41, %s3009_s15  ;;  %v328_v29 = vand.u32 15, %v254_v16  ;;  %v544_v30 = vrot.slane %v238_v15, 1  ;;  %v256_v36 = vadd.s32 88, %v3106_v6  ;;  %v545_v43 = vrot.slane %v239_v18, 1 }
  0x29   : > { %2810 = vmatpush3.bf16.msra.mxu0 %v2807_v37  ;;  %2897 = vmatpush3.bf16.msra.mxu1 %v2807_v37  ;;  %v3282_v27 = vsel %vm4407_vm3, %v494_v7, %v495_v23  ;;  %v3286_v31 = vsel %vm4407_vm3, %v495_v23, %v496_v20  ;;  %v241_v37 = vld [vmem:[%s3118_s6 + $0x68] sm:$0xff]  ;;  %v557_v40 = vsel %vm4406_vm0, %v542_v3, %v543_v28  ;;  %v546_v45 = vrot.slane %v240_v34, 1 }
  0x2a   : > { %2812 = vmatprep.subr.bf16.mxu0 %v2811_v60  ;;  %2892 = vmatprep.subr.bf16.mxu1 %v2811_v60  ;;  %vm3290_vm6 = vcmp.eq.s32.totalorder %v328_v29, 15  ;;  %v556_v33 = vsel %vm4406_vm0, %v543_v28, %v544_v30  ;;  %v342_v44 = vand.u32 15, %v256_v36  ;;  %v258_v50 = vadd.s32 104, %v3106_v6 }
  0x2b   : > { %v576_v41 = vsel %vm3290_vm6, 0.0, %v556_v33  ;;  %v554_v49 = vsel %vm4406_vm0, %v545_v43, %v546_v45  ;;  %v555_v53 = vsel %vm4406_vm0, %v544_v30, %v545_v43  ;;  %v260_v1 = vadd.s32 120, %v3106_v6 }
  0x2c   : > { %607 = vrot.lane.b32.xlu0 %v3146_v21, %s3008_s10  ;;  %609 = vrot.lane.b32.xlu1 %v233_v38, %s3008_s10  ;;  %v3267_v21 = vsel %vm4407_vm3, %v492_v59, %v493_v12  ;;  %v498_v38 = vrot.slane %v241_v37, 7  ;;  %vm3315_vm7 = vcmp.eq.s32.totalorder %v342_v44, 15  ;;  %v356_v59 = vand.u32 15, %v258_v50 }
  0x2d   : > { %2814 = vmatpush3.bf16.msra.mxu0 %v2811_v60  ;;  %2898 = vmatpush3.bf16.msra.mxu1 %v2811_v60  ;;  %v578_v55 = vsel %vm3315_vm7, 0.0, %v554_v49  ;;  %v548_v60 = vrot.slane %v3323_v52, 1  ;;  %v549_v5 = vrot.slane %v3349_v2, 1  ;;  %v370_v7 = vand.u32 15, %v260_v1 }
  0x2e   : > { %vm3341_vm8 = vcmp.eq.s32.totalorder %v356_v59, 15  ;;  %v4449_v12 = vmov 0 }
  0x2f   : > { %vm3360_vm9 = vcmp.eq.s32.totalorder %v370_v7, 15  ;;  %v566_v14 = vsel %vm4406_vm0, %v549_v5, %v534_v19  ;;  %v265_v19 = vand.u32 15, %v3106_v6 }
  0x30   : > { %671 = vrot.lane.b32.xlu0 %v561_v62, %s3009_s15  ;;  %673 = vrot.lane.b32.xlu1 %v572_v63, %s3009_s15  ;;  %v4450_v12 = vsel %vm3360_vm9, 4294967295, %v4449_v12  ;;  %v582_v16 = vsel %vm3360_vm9, 0.0, %v566_v14 }
  0x31   : > { %vm3380_vm10 = vcmp.eq.s32.totalorder %v265_v19, 0 }
  0x34   : > { %611 = vrot.lane.b32.xlu0 %v3182_v39, %s3008_s10  ;;  %613 = vrot.lane.b32.xlu1 %v235_v56, %s3008_s10  ;;  %v497_v39 = vrot.slane %v240_v34, 7  ;;  %v499_v56 = vrot.slane %v3323_v52, 7 }
  0x36   : > { %v3307_v42 = vsel %vm4407_vm3, %v496_v20, %v497_v39  ;;  %v3311_v46 = vsel %vm4407_vm3, %v497_v39, %v498_v38  ;;  %v3337_v62 = vsel %vm4407_vm3, %v498_v38, %v499_v56  ;;  %v4451_v20 = vmov 0 }
  0x37   : > { %v4452_v20 = vsel %vm3380_vm10, 4294967295, %v4451_v20 }
  0x38   : > { %675 = vrot.lane.b32.xlu0 %v559_v24, %s3009_s15  ;;  %677 = vrot.lane.b32.xlu1 %v574_v25, %s3009_s15  ;;  %v247_v24 = vadd.s32 16, %v3106_v6 }
  0x3a   : > { %v279_v30 = vand.u32 15, %v247_v24 }
  0x3c   : > { %615 = vrot.lane.b32.xlu0 %v236_v57, %s3008_s10  ;;  %617 = vrot.lane.b32.xlu1 %v237_v4, %s3008_s10  ;;  %v547_v57 = vrot.slane %v241_v37, 1  ;;  %vm3396_vm14 = vcmp.eq.s32.totalorder %v279_v30, 0 }
  0x3e   : > { %v552_v0 = vsel %vm4406_vm0, %v547_v57, %v548_v60  ;;  %v553_v3 = vsel %vm4406_vm0, %v546_v45, %v547_v57  ;;  %v251_v57 = vadd.s32 48, %v3106_v6 }
  0x3f   : > { %v580_v4 = vsel %vm3341_vm8, 0.0, %v552_v0 }
  0x40   : > { %679 = vrot.lane.b32.xlu0 %v557_v40, %s3009_s15  ;;  %681 = vrot.lane.b32.xlu1 %v576_v41, %s3009_s15  ;;  %v520_v41 = vsel %vm3396_vm14, 0.0, %v3229_v61  ;;  %v4455_v61 = vmov 0  ;;  %v307_v0 = vand.u32 15, %v251_v57 }
  0x44   : > { %619 = vrot.lane.b32.xlu0 %v238_v15, %s3008_s10  ;;  %621 = vrot.lane.b32.xlu1 %v239_v18, %s3008_s10  ;;  %v551_v15 = vsel %vm4406_vm0, %v548_v60, %v549_v5  ;;  %v500_v18 = vrot.slane %v3349_v2, 7  ;;  %vm3429_vm0 = vcmp.eq.s32.totalorder %v307_v0, 0 }
  0x46   : > { %v517_v23 = vsel %vm4407_vm3, %v500_v18, %v485_v48  ;;  %v4453_v48 = vmov 0 }
  0x47   : > { %v518_v29 = vsel %vm3380_vm10, 0.0, %v517_v23  ;;  %v4454_v48 = vsel %vm3396_vm14, 4294967295, %v4453_v48 }
  0x48   : > { %683 = vrot.lane.b32.xlu0 %v555_v53, %s3009_s15  ;;  %685 = vrot.lane.b32.xlu1 %v578_v55, %s3009_s15 }
  0x4c   : > { %623 = vrot.lane.b32.xlu0 %v240_v34, %s3008_s10  ;;  %625 = vrot.lane.b32.xlu1 %v241_v37, %s3008_s10  ;;  %v249_v37 = vadd.s32 32, %v3106_v6 }
  0x4e   : > { %v293_v44 = vand.u32 15, %v249_v37 }
  0x50   : > { %687 = vrot.lane.b32.xlu0 %v553_v3, %s3009_s15  ;;  %689 = vrot.lane.b32.xlu1 %v580_v4, %s3009_s15  ;;  %vm3414_vm15 = vcmp.eq.s32.totalorder %v293_v44, 0 }
  0x51   : > { %v4456_v61 = vsel %vm3414_vm15, 4294967295, %v4455_v61  ;;  %v522_v60 = vsel %vm3414_vm15, 0.0, %v3240_v8  ;;  %v253_v8 = vadd.s32 64, %v3106_v6  ;;  %vm4471_vm15 = vcmask 785408  }
  0x52   : > { %vm4472_vm14 = vmmov %vm4471_vm15 }
  0x53   : > { %v321_v23 = vand.u32 15, %v253_v8 }
  0x54   : > { %627 = vrot.lane.b32.xlu0 %v3323_v52, %s3008_s10  ;;  %629 = vrot.lane.b32.xlu1 %v3349_v2, %s3008_s10  ;;  %v2445_v52 = vld [vmem:[%s4401_s1 + $0x60] sm:$0xff] }
  0x55   : > { %vm3444_vm3 = vcmp.eq.s32.totalorder %v321_v23, 0 }
  0x58   : > { %691 = vrot.lane.b32.xlu0 %v551_v15, %s3009_s15  ;;  %693 = vrot.lane.b32.xlu1 %v582_v16, %s3009_s15  ;;  %v4457_v15 = vmov 0 }
  0x59   : > { %v4458_v15 = vsel %vm3429_vm0, 4294967295, %v4457_v15 }
  0x8e   : > { %v606_v25 = vpop.permute.xlu1 %605  ;;  %v600_v28 = vpop.permute.xlu0 %599 }
  0x8f   : > { %v712_v33 = vsel %vm4420_vm11, %v518_v29, %v600_v28  ;;  %v715_v45 = vsel %vm4420_vm11, %v3214_v54, %v606_v25 }
  0x92   : > { %v602_v34 = vpop.permute.xlu0 %601  ;;  %v664_v17 = vpop.permute.xlu1 %663 }
  0x93   : > { %v729_v36 = vsel %vm4412_vm12, %v712_v33, %v664_v17  ;;  %v713_v38 = vsel %vm4420_vm11, %v3222_v58, %v602_v34  ;;  %v4459_v34 = vmov 0 }
  0x94   : > { %2636 = vmatprep.mubr.msk.f32.mxu0 %vm4415_vm13, %v729_v36  ;;  %v4460_v34 = vsel %vm3444_vm3, 4294967295, %v4459_v34 }
  0x96   : > { %v604_v39 = vpop.permute.xlu0 %603  ;;  %v666_v40 = vpop.permute.xlu1 %665 }
  0x97   : > { %v730_v43 = vsel %vm4412_vm12, %v713_v38, %v666_v40  ;;  %v714_v49 = vsel %vm4420_vm11, %v520_v41, %v604_v39 }
  0x98   : > { %2637 = vmatmul.mubr.msk.f32.vlgmr.msra.gmra.mrb[0].mxu0 %vm4415_vm13, %v730_v43 }
  0x9a   : > { %v668_v50 = vpop.permute.xlu0 %667  ;;  %v670_v53 = vpop.permute.xlu1 %669 }
  0x9b   : > { %v731_v58 = vsel %vm4412_vm12, %v714_v49, %v668_v50  ;;  %v732_v55 = vsel %vm4412_vm12, %v715_v45, %v670_v53  ;;  %v4461_v45 = vmov 0 }
  0x9c   : > { %2639 = vmatprep.mubr.msk.f32.mxu0 %vm4415_vm13, %v731_v58 }
  0x9d   : > { %2640 = vmatmul.mubr.msk.f32.gmra.mrb[2].mxu0 %vm4415_vm13, %v732_v55 }
  0x9e   : > { %v608_v59 = vpop.permute.xlu0 %607  ;;  %v610_v54 = vpop.permute.xlu1 %609 }
  0x9f   : > { %v716_v1 = vsel %vm4420_vm11, %v522_v60, %v608_v59  ;;  %v717_v3 = vsel %vm4420_vm11, %v3244_v9, %v610_v54  ;;  %v524_v9 = vsel %vm3429_vm0, 0.0, %v3250_v10  ;;  %v255_v10 = vadd.s32 80, %v3106_v6 }
  0xa0   : > { %v259_v54 = vadd.s32 112, %v3106_v6 }
  0xa1   : > { %v335_v37 = vand.u32 15, %v255_v10 }
  0xa2   : > { %v672_v4 = vpop.permute.xlu0 %671  ;;  %v674_v5 = vpop.permute.xlu1 %673 }
  0xa3   : > { %v733_v7 = vsel %vm4412_vm12, %v716_v1, %v672_v4  ;;  %v734_v14 = vsel %vm4412_vm12, %v717_v3, %v674_v5  ;;  %vm3459_vm0 = vcmp.eq.s32.totalorder %v335_v37, 0  ;;  %v4463_v1 = vmov 0  ;;  %v3530_v37 = vld [vmem:[%s4402_s2] ss:$0 sm:$0xff] }
  0xa4   : > { %2642 = vmatprep.mubr.msk.f32.mxu0 %vm4415_vm13, %v733_v7  ;;  %v4462_v45 = vsel %vm3459_vm0, 4294967295, %v4461_v45  ;;  %v363_v4 = vand.u32 15, %v259_v54 }
  0xa5   : > { %2643 = vmatmul.mubr.msk.f32.gmra.mrb[4].mxu0 %vm4415_vm13, %v734_v14 }
  0xa6   : > { %v612_v16 = vpop.permute.xlu0 %611  ;;  %v614_v19 = vpop.permute.xlu1 %613 }
  0xa7   : > { %v718_v24 = vsel %vm4420_vm11, %v524_v9, %v612_v16  ;;  %v719_v25 = vsel %vm4420_vm11, %v3254_v11, %v614_v19  ;;  %v526_v11 = vsel %vm3444_vm3, 0.0, %v3267_v21  ;;  %v257_v21 = vadd.s32 96, %v3106_v6 }
  0xa8   : > { %v4466_v16 = vmov 0 }
  0xa9   : > { %v349_v53 = vand.u32 15, %v257_v21 }
  0xaa   : > { %v676_v28 = vpop.permute.xlu0 %675  ;;  %v678_v29 = vpop.permute.xlu1 %677 }
  0xab   : > { %v735_v30 = vsel %vm4412_vm12, %v718_v24, %v676_v28  ;;  %v736_v33 = vsel %vm4412_vm12, %v719_v25, %v678_v29  ;;  %vm3475_vm3 = vcmp.eq.s32.totalorder %v349_v53, 0 }
  0xac   : > { %2645 = vmatprep.mubr.msk.f32.mxu0 %vm4415_vm13, %v735_v30  ;;  %v4464_v1 = vsel %vm3475_vm3, 4294967295, %v4463_v1 }
  0xad   : > { %2646 = vmatmul.mubr.msk.f32.gmra.mrb[6].mxu0 %vm4415_vm13, %v736_v33  ;;  %4465 = vst [vmem:[#allocation5_spill] sm:$0xff] %v4464_v1 }
  0xae   : > { %v616_v17 = vpop.permute.xlu0 %615  ;;  %v618_v36 = vpop.permute.xlu1 %617 }
  0xaf   : > { %v720_v38 = vsel %vm4420_vm11, %v526_v11, %v616_v17  ;;  %v721_v39 = vsel %vm4420_vm11, %v3271_v22, %v618_v36  ;;  %v528_v22 = vsel %vm3459_vm0, 0.0, %v3282_v27  ;;  %vm4469_vm0 = vcmask 523264   ;;  %v2449_v36 = vld [vmem:[%s4401_s1 + $0x80] sm:$0xff]  ;;  %v2450_v11 = vld [vmem:[%s4401_s1 + $0x88] sm:$0xff] }
  0xb2   : > { %v680_v40 = vpop.permute.xlu0 %679  ;;  %v682_v41 = vpop.permute.xlu1 %681 }
  0xb3   : > { %v737_v43 = vsel %vm4412_vm12, %v720_v38, %v680_v40  ;;  %v738_v44 = vsel %vm4412_vm12, %v721_v39, %v682_v41  ;;  %v2823_v38 = vpack.c.bf16 %v2450_v11, %v2449_v36 }
  0xb4   : > { %2648 = vmatprep.mubr.msk.f32.mxu0 %vm4415_vm13, %v737_v43 }
  0xb5   : > { %2649 = vmatmul.mubr.msk.f32.gmra.mrb[8].mxu0 %vm4415_vm13, %v738_v44 }
  0xb6   : > { %v620_v49 = vpop.permute.xlu0 %619  ;;  %v622_v50 = vpop.permute.xlu1 %621 }
  0xb7   : > { %v722_v58 = vsel %vm4420_vm11, %v528_v22, %v620_v49  ;;  %v723_v55 = vsel %vm4420_vm11, %v3286_v31, %v622_v50  ;;  %v530_v31 = vsel %vm3475_vm3, 0.0, %v3307_v42 }
  0xba   : > { %v684_v57 = vpop.permute.xlu0 %683  ;;  %v686_v59 = vpop.permute.xlu1 %685 }
  0xbb   : > { %v739_v60 = vsel %vm4412_vm12, %v722_v58, %v684_v57  ;;  %v740_v0 = vsel %vm4412_vm12, %v723_v55, %v686_v59  ;;  %vm3486_vm12 = vcmp.eq.s32.totalorder %v363_v4, 0 }
  0xbc   : > { %2651 = vmatprep.mubr.msk.f32.mxu0 %vm4415_vm13, %v739_v60  ;;  %v4467_v16 = vsel %vm3486_vm12, 4294967295, %v4466_v16  ;;  %v532_v42 = vsel %vm3486_vm12, 0.0, %v3337_v62  ;;  %vm4478_vm12 = vcmask 785408   ;;  %v2447_v62 = vld [vmem:[%s4401_s1 + $0x70] sm:$0xff] }
  0xbd   : > { %2652 = vmatmul.mubr.msk.f32.gmra.mrb[10].mxu0 %vm4415_vm13, %v740_v0  ;;  %4468 = vst [vmem:[#allocation6_spill] sm:$0xff] %v4467_v16  ;;  %vm4470_vm13 = vmmov %vm4469_vm0 }
  0xbe   : > { %v624_v27 = vpop.permute.xlu0 %623  ;;  %v626_v3 = vpop.permute.xlu1 %625  ;;  %vm4479_vm3 = vmmov %vm4478_vm12 }
  0xbf   : > { %v724_v5 = vsel %vm4420_vm11, %v530_v31, %v624_v27  ;;  %v725_v7 = vsel %vm4420_vm11, %v3311_v46, %v626_v3  ;;  %vm4473_vm11 = vcmp.lt.s32.totalorder %v3106_v6, 1 }
  0xc0   : > { %v502_v46 = vsel %vm4473_vm11, %v499_v56, %v500_v18  ;;  %v2446_v56 = vld [vmem:[%s4401_s1 + $0x68] sm:$0xff]  ;;  %v2448_v18 = vld [vmem:[%s4401_s1 + $0x78] sm:$0xff] }
  0xc1   : > { %v2815_v2 = vpack.c.bf16 %v2446_v56, %v2445_v52  ;;  %v2819_v17 = vpack.c.bf16 %v2448_v18, %v2447_v62 }
  0xc2   : > { %v688_v14 = vpop.permute.xlu0 %687  ;;  %v690_v8 = vpop.permute.xlu1 %689 }
  0xc3   : > { %v742_v19 = vsel %vm4469_vm0, %v725_v7, %v690_v8  ;;  %v741_v9 = vsel %vm4470_vm13, %v724_v5, %v688_v14  ;;  %vm4474_vm0 = vcmask 261120   ;;  %2816 = vmatprep.subr.bf16.mxu1 %v2815_v2 }
  0xc4   : > { %2654 = vmatprep.mubr.msk.f32.mxu1 %vm4471_vm15, %v741_v9  ;;  %vm4475_vm13 = vmmov %vm4474_vm0 }
  0xc5   : > { %2655 = vmatmul.mubr.msk.f32.vlgmr.msra.gmra.mrb[0].mxu1 %vm4472_vm14, %v742_v19  ;;  %vm4476_vm14 = vcmask 523264  }
  0xc6   : > { %v628_v23 = vpop.permute.xlu0 %627  ;;  %v630_v24 = vpop.permute.xlu1 %629  ;;  %vm4477_vm15 = vmmov %vm4476_vm14  ;;  %2818 = vmatpush3.bf16.msra.mxu1 %v2815_v2 }
  0xc7   : > { %v726_v25 = vsel %vm4474_vm0, %v532_v42, %v628_v23  ;;  %v727_v28 = vsel %vm4475_vm13, %v502_v46, %v630_v24  ;;  %2820 = vmatprep.subr.bf16.mxu1 %v2819_v17  ;;  %vm4483_vm13 = vmmov %vm4473_vm11 }
  0xca   : > { %v692_v29 = vpop.permute.xlu0 %691  ;;  %v694_v30 = vpop.permute.xlu1 %693  ;;  %2822 = vmatpush3.bf16.msra.mxu1 %v2819_v17 }
  0xcb   : > { %v743_v33 = vsel %vm4476_vm14, %v726_v25, %v692_v29  ;;  %v744_v10 = vsel %vm4477_vm15, %v727_v28, %v694_v30  ;;  %2824 = vmatprep.subr.bf16.mxu1 %v2823_v38  ;;  %vm4484_vm14 = vmmov %vm4473_vm11 }
  0xcc   : > { %2657 = vmatprep.mubr.msk.f32.mxu1 %vm4478_vm12, %v743_v33 }
  0xcd   : > { %2658 = vmatmul.mubr.msk.f32.gmra.mrb[2].mxu1 %vm4479_vm3, %v744_v10  ;;  %vm4480_vm3 = vcmp.lt.s32.totalorder %v3106_v6, 7 }
  0xce   : > { %2826 = vmatpush3.bf16.msra.mxu1 %v2823_v38  ;;  %vm4481_vm12 = vmmov %vm4480_vm3 }
  0xcf   : > { %vm4482_vm0 = vmmov %vm4480_vm3 }
  0xd0   : > { %vm4485_vm15 = vmmov %vm4482_vm0 }
 0x16b   : > { %v2638_v39 = vpop.f32.mrb[0].mxu0 }
 0x16c   : > { %v885_v40 = vadd.f32 %v2638_v39, %v3530_v37  ;;  %v879_v41 = vpop.f32.mrb[1].mxu0 }
 0x16d   : > { %v880_v43 = vadd.f32 %v3530_v37, %v879_v41 }
 0x16e   : > { %v959_v44 = vmax.f32 %v885_v40, 0.0 }
 0x16f   : > { %v3534_v21 = vmax.f32 %v880_v43, 0.0 }
 0x170   : > { %v975_v49 = vrot.slane %v959_v44, 7  ;;  %v1023_v50 = vrot.slane %v959_v44, 1  ;;  %1088 = vrot.lane.b32.xlu1 %v959_v44, %s3008_s10  ;;  %v2641_v22 = vpop.f32.mrb[2].mxu0 }
 0x171   : > { %v4425_v53 = vrot.slane %v3534_v21, 7  ;;  %v4426_v58 = vrot.slane %v3534_v21, 1  ;;  %v895_v55 = vadd.f32 %v2641_v22, %v3530_v37  ;;  %v889_v57 = vpop.f32.mrb[3].mxu0  ;;  %1086 = vrot.lane.b32.xlu0 %v3534_v21, %s3008_s10 }
 0x172   : > { %v890_v59 = vadd.f32 %v3530_v37, %v889_v57 }
 0x173   : > { %v3543_v54 = vmax.f32 %v895_v55, 0.0  ;;  %v3549_v60 = vsel %vm4480_vm3, %v4426_v58, %v1023_v50  ;;  %v3555_v0 = vsel %vm4473_vm11, %v4425_v53, %v975_v49  ;;  %vm4486_vm3 = vmmov %vm4482_vm0 }
 0x174   : > { %v3557_v27 = vmax.f32 %v890_v59, 0.0 }
 0x175   : > { %v977_v3 = vrot.slane %v3543_v54, 7  ;;  %v1025_v4 = vrot.slane %v3543_v54, 1 }
 0x176   : > { %v976_v31 = vrot.slane %v3557_v27, 7  ;;  %v1024_v5 = vrot.slane %v3557_v27, 1 }
 0x178   : > { %v2644_v7 = vpop.f32.mrb[4].mxu0  ;;  %v3565_v14 = vsel %vm4481_vm12, %v1023_v50, %v1024_v5  ;;  %v3569_v8 = vsel %vm4482_vm0, %v1024_v5, %v1025_v4  ;;  %v3573_v19 = vsel %vm4483_vm13, %v976_v31, %v977_v3  ;;  %v3577_v9 = vsel %vm4484_vm14, %v975_v49, %v976_v31  ;;  %vm4487_vm12 = vmmov %vm4473_vm11 }
 0x179   : > { %v905_v42 = vadd.f32 %v2644_v7, %v3530_v37  ;;  %v899_v46 = vpop.f32.mrb[5].mxu0  ;;  %vm4488_vm13 = vmmov %vm4482_vm0 }
 0x17a   : > { %v900_v23 = vadd.f32 %v3530_v37, %v899_v46  ;;  %vm4489_vm14 = vmmov %vm4473_vm11 }
 0x17b   : > { %v3581_v24 = vmax.f32 %v905_v42, 0.0 }
 0x17c   : > { %v3583_v25 = vmax.f32 %v900_v23, 0.0  ;;  %v2451_v23 = vld [vmem:[%s4401_s1 + $0x90] sm:$0xff] }
 0x17d   : > { %v979_v28 = vrot.slane %v3581_v24, 7  ;;  %v1027_v29 = vrot.slane %v3581_v24, 1 }
 0x17e   : > { %v978_v30 = vrot.slane %v3583_v25, 7  ;;  %v1026_v33 = vrot.slane %v3583_v25, 1 }
 0x180   : > { %v2647_v10 = vpop.f32.mrb[6].mxu0  ;;  %v3591_v52 = vsel %vm4485_vm15, %v1025_v4, %v1026_v33  ;;  %v3595_v56 = vsel %vm4486_vm3, %v1026_v33, %v1027_v29  ;;  %v3599_v62 = vsel %vm4473_vm11, %v978_v30, %v979_v28  ;;  %v3603_v2 = vsel %vm4487_vm12, %v977_v3, %v978_v30  ;;  %vm4490_vm15 = vmmov %vm4473_vm11 }
 0x181   : > { %v915_v18 = vadd.f32 %v2647_v10, %v3530_v37  ;;  %v909_v17 = vpop.f32.mrb[7].mxu0  ;;  %vm4491_vm3 = vmmov %vm4482_vm0 }
 0x182   : > { %v910_v36 = vadd.f32 %v3530_v37, %v909_v17  ;;  %vm4492_vm11 = vmmov %vm4482_vm0 }
 0x183   : > { %v3607_v11 = vmax.f32 %v915_v18, 0.0 }
 0x184   : > { %v3609_v38 = vmax.f32 %v910_v36, 0.0 }
 0x185   : > { %v981_v39 = vrot.slane %v3607_v11, 7  ;;  %v1029_v40 = vrot.slane %v3607_v11, 1 }
 0x186   : > { %v980_v41 = vrot.slane %v3609_v38, 7  ;;  %v1028_v43 = vrot.slane %v3609_v38, 1 }
 0x188   : > { %v2650_v44 = vpop.f32.mrb[8].mxu0  ;;  %v3617_v49 = vsel %vm4482_vm0, %v1027_v29, %v1028_v43  ;;  %v3621_v50 = vsel %vm4488_vm13, %v1028_v43, %v1029_v40  ;;  %v3625_v22 = vsel %vm4489_vm14, %v980_v41, %v981_v39  ;;  %v3629_v55 = vsel %vm4490_vm15, %v979_v28, %v980_v41  ;;  %v2452_v28 = vld [vmem:[%s4401_s1 + $0x98] sm:$0xff]  ;;  %vm4493_vm0 = vmmov %vm4487_vm12 }
 0x189   : > { %v925_v57 = vadd.f32 %v2650_v44, %v3530_v37  ;;  %v919_v59 = vpop.f32.mrb[9].mxu0  ;;  %v2827_v29 = vpack.c.bf16 %v2452_v28, %v2451_v23  ;;  %v2454_v44 = vld [vmem:[%s4401_s1 + $0xa8] sm:$0xff]  ;;  %v2455_v28 = vld [vmem:[%s4401_s1 + $0xb0] sm:$0xff]  ;;  %vm4494_vm13 = vmmov %vm4491_vm3 }
 0x18a   : > { %v920_v3 = vadd.f32 %v3530_v37, %v919_v59  ;;  %vm4495_vm14 = vmmov %vm4491_vm3 }
 0x18b   : > { %v3633_v4 = vmax.f32 %v925_v57, 0.0  ;;  %2828 = vmatprep.subr.bf16.mxu1 %v2827_v29  ;;  %vm4496_vm15 = vmmov %vm4493_vm0 }
 0x18c   : > { %v3635_v31 = vmax.f32 %v920_v3, 0.0  ;;  %2830 = vmatpush3.bf16.msra.mxu1 %v2827_v29  ;;  %v2456_v29 = vld [vmem:[%s4401_s1 + $0xb8] sm:$0xff] }
 0x18d   : > { %v983_v5 = vrot.slane %v3633_v4, 7  ;;  %v1031_v7 = vrot.slane %v3633_v4, 1 }
 0x18e   : > { %v982_v42 = vrot.slane %v3635_v31, 7  ;;  %v1030_v46 = vrot.slane %v3635_v31, 1 }
 0x190   : > { %v2653_v30 = vpop.f32.mrb[10].mxu0  ;;  %v3649_v33 = vsel %vm4491_vm3, %v1029_v40, %v1030_v46  ;;  %v3653_v10 = vsel %vm4492_vm11, %v1030_v46, %v1031_v7  ;;  %v3657_v18 = vsel %vm4487_vm12, %v982_v42, %v983_v5  ;;  %v3661_v17 = vsel %vm4493_vm0, %v981_v39, %v982_v42  ;;  %v2453_v40 = vld [vmem:[%s4401_s1 + $0xa0] sm:$0xff]  ;;  %vm4498_vm3 = vmmov %vm4493_vm0 }
 0x191   : > { %v935_v36 = vadd.f32 %v2653_v30, %v3530_v37  ;;  %v929_v41 = vpop.f32.mrb[11].mxu0  ;;  %v2831_v59 = vpack.c.bf16 %v2454_v44, %v2453_v40  ;;  %v2835_v30 = vpack.c.bf16 %v2456_v29, %v2455_v28  ;;  %vm4499_vm12 = vmmov %vm4492_vm11 }
 0x192   : > { %v930_v43 = vadd.f32 %v3530_v37, %v929_v41 }
 0x193   : > { %v3671_v57 = vmax.f32 %v935_v36, 0.0  ;;  %2832 = vmatprep.subr.bf16.mxu1 %v2831_v59 }
 0x194   : > { %v3673_v39 = vmax.f32 %v930_v43, 0.0  ;;  %2834 = vmatpush3.bf16.msra.mxu1 %v2831_v59 }
 0x195   : > { %v985_v3 = vrot.slane %v3671_v57, 7  ;;  %v1033_v42 = vrot.slane %v3671_v57, 1  ;;  %2836 = vmatprep.subr.bf16.mxu1 %v2835_v30 }
 0x196   : > { %v984_v46 = vrot.slane %v3673_v39, 7  ;;  %v1032_v23 = vrot.slane %v3673_v39, 1 }
 0x198   : > { %v2656_v36 = vpop.f32.mrb[0].mxu1  ;;  %v3687_v41 = vsel %vm4494_vm13, %v1031_v7, %v1032_v23  ;;  %v3691_v43 = vsel %vm4495_vm14, %v1032_v23, %v1033_v42  ;;  %v3695_v40 = vsel %vm4496_vm15, %v984_v46, %v985_v3  ;;  %v3699_v44 = vsel %vm4498_vm3, %v983_v5, %v984_v46  ;;  %2838 = vmatpush3.bf16.msra.mxu1 %v2835_v30  ;;  %vm4500_vm13 = vmmov %vm4493_vm0 }
 0x199   : > { %4497 = vst [vmem:[#allocation7_spill] sm:$0xff] %v3695_v40  ;;  %v945_v59 = vadd.f32 %v2656_v36, %v3530_v37  ;;  %v939_v28 = vpop.f32.mrb[1].mxu1  ;;  %vm4502_vm14 = vmmov %vm4492_vm11 }
 0x19a   : > { %v940_v29 = vadd.f32 %v3530_v37, %v939_v28  ;;  %vm4504_vm15 = vmmov %vm4493_vm0 }
 0x19b   : > { %v971_v7 = vmax.f32 %v945_v59, 0.0  ;;  %vm4505_vm3 = vmmov %vm4492_vm11 }
 0x19c   : > { %v970_v53 = vmax.f32 %v940_v29, 0.0 }
 0x19d   : > { %v987_v58 = vrot.slane %v971_v7, 7  ;;  %v1035_v23 = vrot.slane %v971_v7, 1  ;;  %1112 = vrot.lane.b32.xlu1 %v971_v7, %s3008_s10 }
 0x19e   : > { %v986_v16 = vrot.slane %v970_v53, 7  ;;  %v1034_v1 = vrot.slane %v970_v53, 1  ;;  %1110 = vrot.lane.b32.xlu0 %v970_v53, %s3008_s10 }
 0x1a0   : > { %v2659_v40 = vpop.f32.mrb[2].mxu1  ;;  %v1040_v5 = vsel %vm4492_vm11, %v1034_v1, %v1035_v23  ;;  %v1041_v46 = vsel %vm4499_vm12, %v1033_v42, %v1034_v1  ;;  %v3711_v30 = vsel %vm4493_vm0, %v986_v16, %v987_v58  ;;  %v3715_v36 = vsel %vm4500_vm13, %v985_v3, %v986_v16  ;;  %vm4506_vm11 = vmmov %vm4505_vm3 }
 0x1a1   : > { %v955_v59 = vadd.f32 %v2659_v40, %v3530_v37  ;;  %v949_v28 = vpop.f32.mrb[3].mxu1  ;;  %1092 = vrot.lane.b32.xlu1 %v3543_v54, %s3008_s10  ;;  %v4501_v40 = vrot.slane %v3534_v21, 1  ;;  %vm4507_vm12 = vmmov %vm4493_vm0  ;;  %vm4508_vm13 = vcmask 261120  }
 0x1a2   : > { %v950_v53 = vadd.f32 %v3530_v37, %v949_v28  ;;  %1150 = vrot.lane.b32.xlu0 %v3549_v60, %s3009_s15  ;;  %v4503_v37 = vrot.slane %v3534_v21, 7 }
 0x1a3   : > { %v973_v1 = vmax.f32 %v955_v59, 0.0  ;;  %v1055_v59 = vsel %vm3151_vm1, 0.0, %v3565_v14  ;;  %v1057_v14 = vsel %vm3174_vm2, 0.0, %v3591_v52 }
 0x1a4   : > { %v972_v42 = vmax.f32 %v950_v53, 0.0 }
 0x1a5   : > { %v989_v29 = vrot.slane %v973_v1, 7  ;;  %v1037_v7 = vrot.slane %v973_v1, 1  ;;  %1096 = vrot.lane.b32.xlu1 %v3581_v24, %s3008_s10 }
 0x1a6   : > { %v988_v16 = vrot.slane %v972_v42, 7  ;;  %v1036_v3 = vrot.slane %v972_v42, 1  ;;  %1174 = vrot.lane.b32.xlu0 %v1040_v5, %s3009_s15 }
 0x1a7   : > { %v1053_v54 = vsel %vm4502_vm14, %v1037_v7, %v4501_v40  ;;  %v1005_v60 = vsel %vm4504_vm15, %v989_v29, %v4503_v37  ;;  %vm4509_vm14 = vcmask 523264   ;;  %vm4510_vm15 = vcmask 785408  }
 0x1a8   : > { %v1039_v24 = vsel %vm4505_vm3, %v1035_v23, %v1036_v3  ;;  %v1038_v5 = vsel %vm4506_vm11, %v1036_v3, %v1037_v7  ;;  %v3744_v28 = vsel %vm4507_vm12, %v988_v16, %v989_v29  ;;  %v3748_v21 = vsel %vm4493_vm0, %v987_v58, %v988_v16  ;;  %vm4511_vm3 = vmmov %vm4508_vm13 }
 0x1a9   : > { %1152 = vrot.lane.b32.xlu1 %v1055_v59, %s3009_s15  ;;  %v1059_v58 = vsel %vm3205_vm4, 0.0, %v3617_v49  ;;  %v1067_v52 = vsel %vm3341_vm8, 0.0, %v1039_v24  ;;  %vm4512_vm11 = vmmov %vm4509_vm14  ;;  %vm4514_vm0 = vnez %v4454_v48 }
 0x1aa   : > { %1090 = vrot.lane.b32.xlu0 %v3557_v27, %s3008_s10  ;;  %v1061_v27 = vsel %vm3256_vm5, 0.0, %v3649_v33  ;;  %vm4513_vm12 = vmmov %vm4510_vm15 }
 0x1ad   : > { %1100 = vrot.lane.b32.xlu1 %v3607_v11, %s3008_s10 }
 0x1ae   : > { %1154 = vrot.lane.b32.xlu0 %v3569_v8, %s3009_s15  ;;  %v1065_v8 = vsel %vm3315_vm7, 0.0, %v1041_v46 }
 0x1b1   : > { %1156 = vrot.lane.b32.xlu1 %v1057_v14, %s3009_s15 }
 0x1b2   : > { %1094 = vrot.lane.b32.xlu0 %v3583_v25, %s3008_s10  ;;  %v1063_v25 = vsel %vm3290_vm6, 0.0, %v3687_v41 }
 0x1b5   : > { %1104 = vrot.lane.b32.xlu1 %v3633_v4, %s3008_s10  ;;  %v1006_v4 = vsel %vm3380_vm10, 0.0, %v1005_v60  ;;  %vm4539_vm10 = vcmask 785408  }
 0x1b6   : > { %1158 = vrot.lane.b32.xlu0 %v3595_v56, %s3009_s15  ;;  %v1069_v56 = vsel %vm3360_vm9, 0.0, %v1053_v54  ;;  %vm4542_vm9 = vmmov %vm4539_vm10 }
 0x1b9   : > { %1160 = vrot.lane.b32.xlu1 %v1059_v58, %s3009_s15 }
 0x1ba   : > { %1098 = vrot.lane.b32.xlu0 %v3609_v38, %s3008_s10 }
 0x1bd   : > { %1108 = vrot.lane.b32.xlu1 %v3671_v57, %s3008_s10 }
 0x1be   : > { %1162 = vrot.lane.b32.xlu0 %v3621_v50, %s3009_s15 }
 0x1c1   : > { %1164 = vrot.lane.b32.xlu1 %v1061_v27, %s3009_s15 }
 0x1c2   : > { %1102 = vrot.lane.b32.xlu0 %v3635_v31, %s3008_s10 }
 0x1c5   : > { %1172 = vrot.lane.b32.xlu1 %v1065_v8, %s3009_s15 }
 0x1c6   : > { %1166 = vrot.lane.b32.xlu0 %v3653_v10, %s3009_s15 }
 0x1c9   : > { %1168 = vrot.lane.b32.xlu1 %v1063_v25, %s3009_s15 }
 0x1ca   : > { %1106 = vrot.lane.b32.xlu0 %v3673_v39, %s3008_s10 }
 0x1cd   : > { %1176 = vrot.lane.b32.xlu1 %v1067_v52, %s3009_s15 }
 0x1ce   : > { %1170 = vrot.lane.b32.xlu0 %v3691_v43, %s3009_s15 }
 0x1d1   : > { %1116 = vrot.lane.b32.xlu1 %v973_v1, %s3008_s10  ;;  %v1008_v1 = vsel %vm4514_vm0, 0.0, %v3577_v9  ;;  %vm4518_vm0 = vnez %v4456_v61 }
 0x1d2   : > { %1114 = vrot.lane.b32.xlu0 %v972_v42, %s3008_s10  ;;  %v1010_v9 = vsel %vm4518_vm0, 0.0, %v3603_v2  ;;  %vm4522_vm0 = vnez %v4458_v15 }
 0x1d3   : > { %v1012_v2 = vsel %vm4522_vm0, 0.0, %v3629_v55  ;;  %vm4526_vm0 = vnez %v4460_v34 }
 0x1d4   : > { %v1014_v55 = vsel %vm4526_vm0, 0.0, %v3661_v17  ;;  %vm4530_vm0 = vnez %v4462_v45 }
 0x1d5   : > { %1180 = vrot.lane.b32.xlu1 %v1069_v56, %s3009_s15  ;;  %v1016_v17 = vsel %vm4530_vm0, 0.0, %v3699_v44 }
 0x1d6   : > { %1178 = vrot.lane.b32.xlu0 %v1038_v5, %s3009_s15 }
 0x1e2   : > { %v1089_v11 = vpop.permute.xlu1 %1088 }
 0x1e3   : > { %v1087_v38 = vpop.permute.xlu0 %1086  ;;  %v1199_v43 = vsel %vm4511_vm3, %v3555_v0, %v1089_v11 }
 0x1e4   : > { %v1198_v33 = vsel %vm4508_vm13, %v1006_v4, %v1087_v38  ;;  %vm4515_vm13 = vmmov %vm4511_vm3 }
 0x20f   : > { %v3804_v49 = vpop.permute.xlu1 %1112 }
 0x210   : > { %v3806_v50 = vpop.permute.xlu0 %1110 }
 0x213   : > { %v1093_v31 = vpop.permute.xlu1 %1092 }
 0x214   : > { %v1151_v10 = vpop.permute.xlu0 %1150  ;;  %v1201_v0 = vsel %vm4511_vm3, %v3573_v19, %v1093_v31 }
 0x215   : > { %v1214_v57 = vsel %vm4509_vm14, %v1198_v33, %v1151_v10  ;;  %vm4516_vm14 = vmmov %vm4512_vm11 }
 0x216   : > { %2684 = vmatprep.mubr.msk.f32.mxu1 %vm4510_vm15, %v1214_v57  ;;  %vm4517_vm15 = vmmov %vm4513_vm12 }
 0x217   : > { %v1097_v39 = vpop.permute.xlu1 %1096 }
 0x218   : > { %v1175_v41 = vpop.permute.xlu0 %1174  ;;  %v1203_v19 = vsel %vm4511_vm3, %v3599_v62, %v1097_v39 }
 0x21b   : > { %v1153_v23 = vpop.permute.xlu1 %1152 }
 0x21c   : > { %v1215_v46 = vsel %vm4512_vm11, %v1199_v43, %v1153_v23  ;;  %v1091_v53 = vpop.permute.xlu0 %1090 }
 0x21d   : > { %2685 = vmatmul.mubr.msk.f32.vlgmr.msra.gmra.mrb[4].mxu1 %vm4513_vm12, %v1215_v46  ;;  %v1200_v29 = vsel %vm4515_vm13, %v1008_v1, %v1091_v53  ;;  %vm4519_vm13 = vmmov %vm4511_vm3  ;;  %v4532_v1 = vld [vmem:[#allocation5_spill] sm:$0xff] }
 0x21f   : > { %v1101_v42 = vpop.permute.xlu1 %1100 }
 0x220   : > { %v1155_v7 = vpop.permute.xlu0 %1154  ;;  %v1205_v62 = vsel %vm4511_vm3, %v3625_v22, %v1101_v42 }
 0x221   : > { %v1216_v16 = vsel %vm4516_vm14, %v1200_v29, %v1155_v7  ;;  %vm4520_vm14 = vmmov %vm4512_vm11  ;;  %v4534_v29 = vld [vmem:[#allocation7_spill] sm:$0xff] }
 0x222   : > { %2687 = vmatprep.mubr.msk.f32.mxu1 %vm4517_vm15, %v1216_v16  ;;  %vm4521_vm15 = vmmov %vm4513_vm12 }
 0x223   : > { %v1157_v3 = vpop.permute.xlu1 %1156 }
 0x224   : > { %v1217_v40 = vsel %vm4512_vm11, %v1201_v0, %v1157_v3  ;;  %v1095_v54 = vpop.permute.xlu0 %1094 }
 0x225   : > { %2688 = vmatmul.mubr.msk.f32.gmra.mrb[6].mxu1 %vm4513_vm12, %v1217_v40  ;;  %v1202_v60 = vsel %vm4519_vm13, %v1010_v9, %v1095_v54  ;;  %vm4523_vm13 = vmmov %vm4511_vm3 }
 0x227   : > { %v1105_v37 = vpop.permute.xlu1 %1104 }
 0x228   : > { %v1159_v59 = vpop.permute.xlu0 %1158  ;;  %v1207_v22 = vsel %vm4511_vm3, %v3657_v18, %v1105_v37 }
 0x229   : > { %v1218_v24 = vsel %vm4520_vm14, %v1202_v60, %v1159_v59  ;;  %vm4524_vm14 = vmmov %vm4512_vm11 }
 0x22a   : > { %2690 = vmatprep.mubr.msk.f32.mxu1 %vm4521_vm15, %v1218_v24  ;;  %vm4525_vm15 = vmmov %vm4513_vm12 }
 0x22b   : > { %v1161_v5 = vpop.permute.xlu1 %1160 }
 0x22c   : > { %v1219_v14 = vsel %vm4512_vm11, %v1203_v19, %v1161_v5  ;;  %v1099_v58 = vpop.permute.xlu0 %1098  ;;  %v2478_v5 = vld [vmem:[%s4401_s1 + $0xd8] sm:$0xff] }
 0x22d   : > { %2691 = vmatmul.mubr.msk.f32.gmra.mrb[8].mxu1 %vm4513_vm12, %v1219_v14  ;;  %v1204_v8 = vsel %vm4523_vm13, %v1012_v2, %v1099_v58  ;;  %vm4527_vm13 = vmmov %vm4511_vm3  ;;  %v2479_v58 = vld [vmem:[%s4401_s1 + $0xe0] sm:$0xff]  ;;  %v2480_v2 = vld [vmem:[%s4401_s1 + $0xe8] sm:$0xff] }
 0x22f   : > { %v1109_v27 = vpop.permute.xlu1 %1108 }
 0x230   : > { %v1163_v25 = vpop.permute.xlu0 %1162 }
 0x231   : > { %v1220_v52 = vsel %vm4524_vm14, %v1204_v8, %v1163_v25  ;;  %vm4528_vm14 = vmmov %vm4512_vm11  ;;  %v3910_v8 = vld [vmem:[%s4402_s2 + $0x1] ss:$0 sm:$0xff]  ;;  %v2481_v25 = vld [vmem:[%s4401_s1 + $0xf0] sm:$0xff] }
 0x232   : > { %2693 = vmatprep.mubr.msk.f32.mxu1 %vm4525_vm15, %v1220_v52  ;;  %vm4529_vm15 = vmmov %vm4513_vm12  ;;  %v2482_v52 = vld [vmem:[%s4401_s1 + $0xf8] sm:$0xff] }
 0x233   : > { %v1165_v56 = vpop.permute.xlu1 %1164 }
 0x234   : > { %v1221_v11 = vsel %vm4512_vm11, %v1205_v62, %v1165_v56  ;;  %v1103_v38 = vpop.permute.xlu0 %1102  ;;  %v2851_v56 = vpack.c.bf16 %v2482_v52, %v2481_v25 }
 0x235   : > { %2694 = vmatmul.mubr.msk.f32.gmra.mrb[10].mxu1 %vm4513_vm12, %v1221_v11  ;;  %v1206_v31 = vsel %vm4527_vm13, %v1014_v55, %v1103_v38  ;;  %vm4531_vm13 = vmmov %vm4511_vm3 }
 0x237   : > { %v1173_v4 = vpop.permute.xlu1 %1172 }
 0x238   : > { %v1167_v33 = vpop.permute.xlu0 %1166 }
 0x239   : > { %v1222_v10 = vsel %vm4528_vm14, %v1206_v31, %v1167_v33  ;;  %vm4533_vm14 = vnez %v4532_v1  ;;  %v2483_v31 = vld [vmem:[%s4401_s1 + $0x100] sm:$0xff]  ;;  %v2484_v33 = vld [vmem:[%s4401_s1 + $0x108] sm:$0xff] }
 0x23a   : > { %2696 = vmatprep.mubr.msk.f32.mxu1 %vm4529_vm15, %v1222_v10  ;;  %v1018_v42 = vsel %vm4533_vm14, 0.0, %v3715_v36  ;;  %vm4535_vm15 = vmmov %vm4511_vm3 }
 0x23b   : > { %v1169_v57 = vpop.permute.xlu1 %1168  ;;  %v1209_v18 = vsel %vm4535_vm15, %v4534_v29, %v1109_v27  ;;  %vm4536_vm3 = vmmov %vm4512_vm11  ;;  %v2847_v27 = vpack.c.bf16 %v2480_v2, %v2479_v58 }
 0x23c   : > { %v1223_v39 = vsel %vm4512_vm11, %v1207_v22, %v1169_v57  ;;  %v1107_v43 = vpop.permute.xlu0 %1106  ;;  %vm4537_vm11 = vmmov %vm4531_vm13  ;;  %v2855_v22 = vpack.c.bf16 %v2484_v33, %v2483_v31 }
 0x23d   : > { %2697 = vmatmul.mubr.msk.f32.gmra.mrb[12].mxu1 %vm4513_vm12, %v1223_v39  ;;  %v1208_v46 = vsel %vm4531_vm13, %v1016_v17, %v1107_v43  ;;  %v1210_v16 = vsel %vm4537_vm11, %v1018_v42, %v3806_v50  ;;  %vm4538_vm12 = vmmov %vm4536_vm3  ;;  %v4545_v50 = vld [vmem:[#allocation6_spill] sm:$0xff] }
 0x23e   : > { %v1225_v0 = vsel %vm4538_vm12, %v1209_v18, %v1173_v4  ;;  %vm4540_vm0 = vmmov %vm4536_vm3 }
 0x23f   : > { %v1177_v23 = vpop.permute.xlu1 %1176  ;;  %v1226_v44 = vsel %vm4540_vm0, %v1210_v16, %v1175_v41  ;;  %vm4541_vm13 = vmmov %vm4539_vm10 }
 0x240   : > { %v1171_v53 = vpop.permute.xlu0 %1170  ;;  %vm4543_vm15 = vmmov %vm4537_vm11  ;;  %vm4546_vm11 = vnez %v4545_v50  ;;  %v2252_v50 = vld [vmem:[%s4403_s3] sm:$0xff] }
 0x241   : > { %v1224_v7 = vsel %vm4536_vm3, %v1208_v46, %v1171_v53  ;;  %v1211_v36 = vsel %vm4543_vm15, %v3711_v30, %v3804_v49  ;;  %vm4544_vm3 = vmmov %vm4540_vm0  ;;  %v1020_v9 = vsel %vm4546_vm11, 0.0, %v3748_v21  ;;  %v2475_v30 = vld [vmem:[%s4401_s1 + $0xc0] sm:$0xff]  ;;  %v2476_v21 = vld [vmem:[%s4401_s1 + $0xc8] sm:$0xff] }
 0x242   : > { %2699 = vmatprep.mubr.msk.f32.mxu1 %vm4539_vm10, %v1224_v7  ;;  %v1227_v54 = vsel %vm4544_vm3, %v1211_v36, %v1177_v23  ;;  %vm4547_vm10 = vmmov %vm4542_vm9  ;;  %v2839_v49 = vpack.c.bf16 %v2476_v21, %v2475_v30  ;;  %v2485_v23 = vld [vmem:[%s4401_s1 + $0x110] sm:$0xff]  ;;  %v2486_v46 = vld [vmem:[%s4401_s1 + $0x118] sm:$0xff] }
 0x243   : > { %v1117_v3 = vpop.permute.xlu1 %1116  ;;  %2700 = vmatmul.mubr.msk.f32.gmra.mrb[14].mxu1 %vm4541_vm13, %v1225_v0  ;;  %vm4548_vm0 = vmmov %vm4543_vm15  ;;  %v2859_v18 = vpack.c.bf16 %v2486_v46, %v2485_v23 }
 0x244   : > { %v1115_v40 = vpop.permute.xlu0 %1114  ;;  %2702 = vmatprep.mubr.msk.f32.mxu1 %vm4542_vm9, %v1226_v44  ;;  %vm4549_vm12 = vmmov %vm4548_vm0  ;;  %2840 = vmatprep.subr.bf16.mxu0 %v2839_v49 }
 0x245   : > { %v1212_v41 = vsel %vm4548_vm0, %v1020_v9, %v1115_v40  ;;  %v1213_v59 = vsel %vm4549_vm12, %v3744_v28, %v1117_v3  ;;  %vm4550_vm9 = vmmov %vm4544_vm3  ;;  %2842 = vmatpush3.bf16.msra.mxu0 %v2839_v49  ;;  %v2477_v28 = vld [vmem:[%s4401_s1 + $0xd0] sm:$0xff]  ;;  %vm4555_vm0 = vcmp.lt.s32.totalorder %v3106_v6, 1 }
 0x246   : > { %vm4551_vm13 = vmmov %vm4544_vm3  ;;  %v2843_v14 = vpack.c.bf16 %v2478_v5, %v2477_v28 }
 0x247   : > { %v1181_v37 = vpop.permute.xlu1 %1180  ;;  %2703 = vmatmul.mubr.msk.f32.gmra.mrb[16].mxu1 %vm4547_vm10, %v1227_v54  ;;  %vm4552_vm15 = vmmov %vm4547_vm10 }
 0x248   : > { %v1179_v60 = vpop.permute.xlu0 %1178  ;;  %v1229_v19 = vsel %vm4551_vm13, %v1213_v59, %v1181_v37  ;;  %vm4553_vm3 = vmmov %vm4547_vm10  ;;  %2844 = vmatprep.subr.bf16.mxu0 %v2843_v14  ;;  %vm4554_vm10 = vcmp.lt.s32.totalorder %v3106_v6, 7 }
 0x249   : > { %v1228_v24 = vsel %vm4550_vm9, %v1212_v41, %v1179_v60  ;;  %2846 = vmatpush3.bf16.msra.mxu0 %v2843_v14  ;;  %vm4556_vm12 = vmmov %vm4554_vm10 }
 0x24a   : > { %2705 = vmatprep.mubr.msk.f32.mxu1 %vm4552_vm15, %v1228_v24  ;;  %2848 = vmatprep.subr.bf16.mxu0 %v2847_v27  ;;  %vm4557_vm9 = vmmov %vm4554_vm10 }
 0x24b   : > { %2706 = vmatmul.mubr.msk.f32.gmra.mrb[18].mxu1 %vm4553_vm3, %v1229_v19  ;;  %vm4558_vm13 = vmmov %vm4555_vm0 }
 0x24c   : > { %vm4559_vm15 = vmmov %vm4555_vm0 }
 0x24d   : > { %2850 = vmatpush3.bf16.msra.mxu0 %v2847_v27  ;;  %vm4560_vm3 = vmmov %vm4557_vm9 }
 0x24e   : > { %2852 = vmatprep.subr.bf16.mxu0 %v2851_v56 }
 0x251   : > { %2854 = vmatpush3.bf16.msra.mxu0 %v2851_v56 }
 0x252   : > { %2856 = vmatprep.subr.bf16.mxu0 %v2855_v22 }
 0x255   : > { %2858 = vmatpush3.bf16.msra.mxu0 %v2855_v22 }
 0x256   : > { %2860 = vmatprep.subr.bf16.mxu0 %v2859_v18 }
 0x259   : > { %2862 = vmatpush3.bf16.msra.mxu0 %v2859_v18 }
 0x2f0   : > { %v2686_v62 = vpop.f32.mrb[4].mxu1 }
 0x2f1   : > { %v1371_v11 = vadd.f32 %v2686_v62, %v3910_v8  ;;  %v1365_v38 = vpop.f32.mrb[5].mxu1 }
 0x2f2   : > { %v1366_v55 = vadd.f32 %v3910_v8, %v1365_v38 }
 0x2f3   : > { %v1445_v4 = vmax.f32 %v1371_v11, 0.0 }
 0x2f4   : > { %v3926_v10 = vmax.f32 %v1366_v55, 0.0 }
 0x2f5   : > { %v1461_v57 = vrot.slane %v1445_v4, 7  ;;  %v1509_v39 = vrot.slane %v1445_v4, 1  ;;  %1574 = vrot.lane.b32.xlu1 %v1445_v4, %s3008_s10 }
 0x2f6   : > { %v1460_v43 = vrot.slane %v3926_v10, 7  ;;  %v1508_v17 = vrot.slane %v3926_v10, 1  ;;  %1572 = vrot.lane.b32.xlu0 %v3926_v10, %s3008_s10 }
 0x2f8   : > { %v2689_v53 = vpop.f32.mrb[6].mxu1  ;;  %v1538_v42 = vsel %vm4554_vm10, %v1508_v17, %v1509_v39  ;;  %v3947_v29 = vsel %vm4555_vm0, %v1460_v43, %v1461_v57  ;;  %vm4561_vm10 = vmmov %vm4560_vm3 }
 0x2f9   : > { %v1381_v7 = vadd.f32 %v2689_v53, %v3910_v8  ;;  %v1375_v16 = vpop.f32.mrb[7].mxu1 }
 0x2fa   : > { %v1376_v0 = vadd.f32 %v3910_v8, %v1375_v16  ;;  %1636 = vrot.lane.b32.xlu0 %v1538_v42, %s3009_s15 }
 0x2fb   : > { %v1447_v44 = vmax.f32 %v1381_v7, 0.0 }
 0x2fc   : > { %v1446_v3 = vmax.f32 %v1376_v0, 0.0 }
 0x2fd   : > { %v1463_v40 = vrot.slane %v1447_v44, 7  ;;  %v1511_v36 = vrot.slane %v1447_v44, 1  ;;  %1578 = vrot.lane.b32.xlu1 %v1447_v44, %s3008_s10 }
 0x2fe   : > { %v1462_v54 = vrot.slane %v1446_v3, 7  ;;  %v1510_v9 = vrot.slane %v1446_v3, 1  ;;  %1576 = vrot.lane.b32.xlu0 %v1446_v3, %s3008_s10 }
 0x300   : > { %v2692_v37 = vpop.f32.mrb[8].mxu1  ;;  %v1536_v41 = vsel %vm4556_vm12, %v1510_v9, %v1511_v36  ;;  %v1537_v60 = vsel %vm4557_vm9, %v1509_v39, %v1510_v9  ;;  %v3960_v59 = vsel %vm4558_vm13, %v1462_v54, %v1463_v40  ;;  %v3964_v24 = vsel %vm4559_vm15, %v1461_v57, %v1462_v54  ;;  %vm4562_vm12 = vmmov %vm4555_vm0 }
 0x301   : > { %v1391_v19 = vadd.f32 %v2692_v37, %v3910_v8  ;;  %v1385_v30 = vpop.f32.mrb[9].mxu1  ;;  %v1541_v27 = vsel %vm3151_vm1, 0.0, %v1537_v60  ;;  %vm4563_vm1 = vmmov %vm4560_vm3 }
 0x302   : > { %v1386_v21 = vadd.f32 %v3910_v8, %v1385_v30  ;;  %1640 = vrot.lane.b32.xlu0 %v1536_v41, %s3009_s15  ;;  %vm4564_vm9 = vmmov %vm4563_vm1 }
 0x303   : > { %v1449_v49 = vmax.f32 %v1391_v19, 0.0  ;;  %vm4565_vm13 = vmmov %vm4555_vm0 }
 0x304   : > { %v1448_v28 = vmax.f32 %v1386_v21, 0.0  ;;  %vm4566_vm15 = vmmov %vm4555_vm0 }
 0x305   : > { %v1465_v5 = vrot.slane %v1449_v49, 7  ;;  %v1513_v14 = vrot.slane %v1449_v49, 1  ;;  %1582 = vrot.lane.b32.xlu1 %v1449_v49, %s3008_s10 }
 0x306   : > { %v1464_v58 = vrot.slane %v1448_v28, 7  ;;  %v1512_v2 = vrot.slane %v1448_v28, 1  ;;  %1580 = vrot.lane.b32.xlu0 %v1448_v28, %s3008_s10 }
 0x308   : > { %v2695_v25 = vpop.f32.mrb[10].mxu1  ;;  %v1534_v52 = vsel %vm4560_vm3, %v1512_v2, %v1513_v14  ;;  %v1535_v62 = vsel %vm4561_vm10, %v1511_v36, %v1512_v2  ;;  %v3979_v56 = vsel %vm4555_vm0, %v1464_v58, %v1465_v5  ;;  %v3983_v11 = vsel %vm4562_vm12, %v1463_v40, %v1464_v58  ;;  %vm4568_vm3 = vmmov %vm4563_vm1 }
 0x309   : > { %v1401_v38 = vadd.f32 %v2695_v25, %v3910_v8  ;;  %v1395_v55 = vpop.f32.mrb[11].mxu1  ;;  %1638 = vrot.lane.b32.xlu1 %v1541_v27, %s3009_s15  ;;  %v1543_v23 = vsel %vm3174_vm2, 0.0, %v1535_v62  ;;  %vm4567_vm2 = vmmov %vm4563_vm1 }
 0x30a   : > { %v1396_v26 = vadd.f32 %v3910_v8, %v1395_v55  ;;  %1644 = vrot.lane.b32.xlu0 %v1534_v52, %s3009_s15  ;;  %vm4569_vm10 = vmmov %vm4555_vm0 }
 0x30b   : > { %v1451_v4 = vmax.f32 %v1401_v38, 0.0  ;;  %vm4571_vm12 = vmmov %vm4563_vm1 }
 0x30c   : > { %v1450_v31 = vmax.f32 %v1396_v26, 0.0 }
 0x30d   : > { %v1467_v33 = vrot.slane %v1451_v4, 7  ;;  %v1515_v22 = vrot.slane %v1451_v4, 1  ;;  %1586 = vrot.lane.b32.xlu1 %v1451_v4, %s3008_s10 }
 0x30e   : > { %v1466_v57 = vrot.slane %v1450_v31, 7  ;;  %v1514_v39 = vrot.slane %v1450_v31, 1  ;;  %1584 = vrot.lane.b32.xlu0 %v1450_v31, %s3008_s10 }
 0x310   : > { %v2698_v46 = vpop.f32.mrb[12].mxu1  ;;  %v1532_v53 = vsel %vm4563_vm1, %v1514_v39, %v1515_v22  ;;  %v1533_v42 = vsel %vm4564_vm9, %v1513_v14, %v1514_v39  ;;  %v3999_v18 = vsel %vm4565_vm13, %v1466_v57, %v1467_v33  ;;  %v4003_v7 = vsel %vm4566_vm15, %v1465_v5, %v1466_v57  ;;  %vm4573_vm9 = vmmov %vm4555_vm0 }
 0x311   : > { %v1411_v16 = vadd.f32 %v2698_v46, %v3910_v8  ;;  %v1405_v0 = vpop.f32.mrb[13].mxu1  ;;  %1642 = vrot.lane.b32.xlu1 %v1543_v23, %s3009_s15  ;;  %v1545_v19 = vsel %vm3205_vm4, 0.0, %v1533_v42  ;;  %vm4570_vm4 = vmmov %vm4563_vm1 }
 0x312   : > { %v1406_v35 = vadd.f32 %v3910_v8, %v1405_v0  ;;  %1648 = vrot.lane.b32.xlu0 %v1532_v53, %s3009_s15  ;;  %vm4572_vm1 = vmmov %vm4555_vm0 }
 0x313   : > { %v1453_v44 = vmax.f32 %v1411_v16, 0.0  ;;  %vm4574_vm13 = vmmov %vm4567_vm2 }
 0x314   : > { %v1452_v3 = vmax.f32 %v1406_v35, 0.0  ;;  %vm4575_vm15 = vmmov %vm4567_vm2 }
 0x315   : > { %v1469_v40 = vrot.slane %v1453_v44, 7  ;;  %v1517_v36 = vrot.slane %v1453_v44, 1  ;;  %1590 = vrot.lane.b32.xlu1 %v1453_v44, %s3008_s10 }
 0x316   : > { %v1468_v54 = vrot.slane %v1452_v3, 7  ;;  %v1516_v9 = vrot.slane %v1452_v3, 1  ;;  %v2701_v37 = vpop.f32.mrb[14].mxu1  ;;  %1588 = vrot.lane.b32.xlu0 %v1452_v3, %s3008_s10 }
 0x317   : > { %v1421_v41 = vadd.f32 %v2701_v37, %v3910_v8  ;;  %v1415_v60 = vpop.f32.mrb[15].mxu1 }
 0x318   : > { %v1416_v30 = vadd.f32 %v3910_v8, %v1415_v60  ;;  %v1530_v21 = vsel %vm4567_vm2, %v1516_v9, %v1517_v36  ;;  %v1531_v49 = vsel %vm4568_vm3, %v1515_v22, %v1516_v9  ;;  %v4021_v28 = vsel %vm4569_vm10, %v1468_v54, %v1469_v40  ;;  %vm4577_vm2 = vmmov %vm4555_vm0 }
 0x319   : > { %v1455_v5 = vmax.f32 %v1421_v41, 0.0  ;;  %1646 = vrot.lane.b32.xlu1 %v1545_v19, %s3009_s15  ;;  %v4026_v14 = vsel %vm4555_vm0, %v1467_v33, %v1468_v54  ;;  %v1547_v42 = vsel %vm3256_vm5, 0.0, %v1531_v49  ;;  %vm4576_vm5 = vmmov %vm4555_vm0 }
 0x31a   : > { %v1454_v51 = vmax.f32 %v1416_v30, 0.0  ;;  %v2704_v58 = vpop.f32.mrb[16].mxu1  ;;  %1652 = vrot.lane.b32.xlu0 %v1530_v21, %s3009_s15  ;;  %vm4578_vm10 = vmmov %vm4555_vm0 }
 0x31b   : > { %v1471_v2 = vrot.slane %v1455_v5, 7  ;;  %v1519_v27 = vrot.slane %v1455_v5, 1  ;;  %v1431_v25 = vadd.f32 %v2704_v58, %v3910_v8  ;;  %v1425_v52 = vpop.f32.mrb[17].mxu1  ;;  %vm4579_vm0 = vmmov %vm4568_vm3 }
 0x31c   : > { %v1470_v62 = vrot.slane %v1454_v51, 7  ;;  %v1518_v38 = vrot.slane %v1454_v51, 1  ;;  %v1426_v55 = vadd.f32 %v3910_v8, %v1425_v52 }
 0x31d   : > { %v1457_v26 = vmax.f32 %v1431_v25, 0.0  ;;  %1594 = vrot.lane.b32.xlu1 %v1455_v5, %s3008_s10 }
 0x31e   : > { %v1456_v4 = vmax.f32 %v1426_v55, 0.0  ;;  %v2707_v31 = vpop.f32.mrb[18].mxu1  ;;  %1592 = vrot.lane.b32.xlu0 %v1454_v51, %s3008_s10  ;;  %v1528_v33 = vsel %vm4570_vm4, %v1518_v38, %v1519_v27  ;;  %v1529_v22 = vsel %vm4571_vm12, %v1517_v36, %v1518_v38  ;;  %v4039_v57 = vsel %vm4572_vm1, %v1470_v62, %v1471_v2  ;;  %vm4580_vm4 = vmmov %vm4579_vm0 }
 0x31f   : > { %v1473_v39 = vrot.slane %v1457_v26, 7  ;;  %v1521_v23 = vrot.slane %v1457_v26, 1  ;;  %v1441_v46 = vadd.f32 %v2707_v31, %v3910_v8  ;;  %v1435_v53 = vpop.f32.mrb[19].mxu1  ;;  %v4047_v44 = vsel %vm4573_vm9, %v1469_v40, %v1470_v62  ;;  %vm4581_vm12 = vmmov %vm4572_vm1 }
 0x320   : > { %v1472_v16 = vrot.slane %v1456_v4, 7  ;;  %v1520_v0 = vrot.slane %v1456_v4, 1  ;;  %v1436_v35 = vadd.f32 %v3910_v8, %v1435_v53  ;;  %v1549_v10 = vsel %vm3290_vm6, 0.0, %v1529_v22 }
 0x321   : > { %v1459_v3 = vmax.f32 %v1441_v46, 0.0  ;;  %1650 = vrot.lane.b32.xlu1 %v1547_v42, %s3009_s15  ;;  %vm4582_vm6 = vnez %v4450_v12  ;;  %vm4583_vm9 = vnez %v4452_v20 }
 0x322   : > { %v1458_v36 = vmax.f32 %v1436_v35, 0.0  ;;  %1656 = vrot.lane.b32.xlu0 %v1528_v33, %s3009_s15  ;;  %v1526_v54 = vsel %vm4574_vm13, %v1520_v0, %v1521_v23  ;;  %v1527_v13 = vsel %vm4575_vm15, %v1519_v27, %v1520_v0  ;;  %v4057_v9 = vsel %vm4576_vm5, %v1472_v16, %v1473_v39 }
 0x323   : > { %v1475_v8 = vrot.slane %v1459_v3, 7  ;;  %v1523_v37 = vrot.slane %v1459_v3, 1  ;;  %v4061_v40 = vsel %vm4577_vm2, %v1471_v2, %v1472_v16  ;;  %vm4584_vm13 = vcmask 261120  }
 0x324   : > { %v1474_v41 = vrot.slane %v1458_v36, 7  ;;  %v1522_v60 = vrot.slane %v1458_v36, 1  ;;  %vm4586_vm15 = vcmask 785408   ;;  %vm4588_vm5 = vnez %v4454_v48 }
 0x325   : > { %1598 = vrot.lane.b32.xlu1 %v1457_v26, %s3008_s10  ;;  %v1539_v19 = vsel %vm4568_vm3, %v1523_v37, %v1508_v17  ;;  %v1491_v30 = vsel %vm4578_vm10, %v1475_v8, %v1460_v43  ;;  %v1551_v43 = vsel %vm3315_vm7, 0.0, %v1527_v13  ;;  %vm4585_vm7 = vcmask 523264  }
 0x326   : > { %1596 = vrot.lane.b32.xlu0 %v1456_v4, %s3008_s10  ;;  %v1524_v21 = vsel %vm4579_vm0, %v1522_v60, %v1523_v37  ;;  %v1525_v49 = vsel %vm4580_vm4, %v1521_v23, %v1522_v60  ;;  %v4079_v5 = vsel %vm4581_vm12, %v1474_v41, %v1475_v8  ;;  %v4083_v17 = vsel %vm4572_vm1, %v1473_v39, %v1474_v41  ;;  %vm4590_vm3 = vmmov %vm4585_vm7 }
 0x327   : > { %v1553_v6 = vsel %vm3341_vm8, 0.0, %v1525_v49  ;;  %v1555_v32 = vsel %vm4582_vm6, 0.0, %v1539_v19  ;;  %v1492_v58 = vsel %vm4583_vm9, 0.0, %v1491_v30  ;;  %vm4587_vm8 = vmmov %vm4584_vm13  ;;  %v1494_v20 = vsel %vm4588_vm5, 0.0, %v3964_v24 }
 0x328   : > { %vm4589_vm2 = vmmov %vm4587_vm8  ;;  %vm4595_vm1 = vnez %v4456_v61  ;;  %vm4602_vm5 = vnez %v4458_v15  ;;  %v1506_v1 = vsel %vm4546_vm11, 0.0, %v4083_v17  ;;  %v2253_v17 = vld [vmem:[%s4403_s3 + $0x8] sm:$0xff]  ;;  %vm1946_vm11 = vcmask 257024  }
 0x329   : > { %1654 = vrot.lane.b32.xlu1 %v1549_v10, %s3009_s15  ;;  %vm4591_vm10 = vmmov %vm4590_vm3  ;;  %v1496_v48 = vsel %vm4595_vm1, 0.0, %v3983_v11  ;;  %v1498_v61 = vsel %vm4602_vm5, 0.0, %v4003_v7  ;;  %vm4606_vm1 = vnez %v4460_v34  ;;  %vm4613_vm5 = vnez %v4462_v45 }
 0x32a   : > { %1660 = vrot.lane.b32.xlu0 %v1526_v54, %s3009_s15  ;;  %vm4592_vm0 = vmmov %vm4586_vm15  ;;  %v1500_v15 = vsel %vm4606_vm1, 0.0, %v4026_v14  ;;  %v1502_v34 = vsel %vm4613_vm5, 0.0, %v4047_v44  ;;  %v1504_v45 = vsel %vm4533_vm14, 0.0, %v4061_v40 }
 0x32b   : > { %vm4593_vm4 = vmmov %vm4592_vm0 }
 0x32c   : > { %vm4594_vm12 = vmmov %vm4589_vm2 }
 0x32d   : > { %1602 = vrot.lane.b32.xlu1 %v1459_v3, %s3008_s10  ;;  %vm4596_vm6 = vmmov %vm4589_vm2 }
 0x32e   : > { %1600 = vrot.lane.b32.xlu0 %v1458_v36, %s3008_s10  ;;  %vm4597_vm9 = vmmov %vm4590_vm3 }
 0x32f   : > { %vm4617_vm1 = vmmov %vm4589_vm2 }
 0x330   : > { %vm4623_vm14 = vmmov %vm4617_vm1 }
 0x331   : > { %1658 = vrot.lane.b32.xlu1 %v1551_v43, %s3009_s15  ;;  %vm4625_vm5 = vmmov %vm4590_vm3 }
 0x332   : > { %1664 = vrot.lane.b32.xlu0 %v1524_v21, %s3009_s15 }
 0x335   : > { %1662 = vrot.lane.b32.xlu1 %v1553_v6, %s3009_s15 }
 0x339   : > { %1666 = vrot.lane.b32.xlu1 %v1555_v32, %s3009_s15 }
 0x367   : > { %v1575_v63 = vpop.permute.xlu1 %1574 }
 0x368   : > { %v1573_v51 = vpop.permute.xlu0 %1572  ;;  %v1685_v55 = vsel %vm4587_vm8, %v3947_v29, %v1575_v63  ;;  %vm4601_vm8 = vmmov %vm4589_vm2 }
 0x369   : > { %v1684_v47 = vsel %vm4584_vm13, %v1492_v58, %v1573_v51  ;;  %vm4598_vm13 = vmmov %vm4590_vm3 }
 0x36c   : > { %v1637_v2 = vpop.permute.xlu0 %1636 }
 0x36d   : > { %v1700_v27 = vsel %vm4585_vm7, %v1684_v47, %v1637_v2  ;;  %vm4599_vm7 = vmmov %vm4592_vm0 }
 0x36e   : > { %2732 = vmatprep.mubr.msk.f32.mxu0 %vm4586_vm15, %v1700_v27  ;;  %vm4600_vm15 = vmmov %vm4592_vm0 }
 0x36f   : > { %v1579_v52 = vpop.permute.xlu1 %1578 }
 0x370   : > { %v1577_v25 = vpop.permute.xlu0 %1576  ;;  %v1687_v29 = vsel %vm4594_vm12, %v3960_v59, %v1579_v52  ;;  %vm4605_vm12 = vmmov %vm4589_vm2 }
 0x371   : > { %v1686_v4 = vsel %vm4589_vm2, %v1494_v20, %v1577_v25  ;;  %v3010_v20 = vmov 0.0|0.0  }
 0x372   : > { %2863 = vmatprep.subr.bf16.mxu1 %v3010_v20 }
 0x374   : > { %v1641_v62 = vpop.permute.xlu0 %1640 }
 0x375   : > { %v1702_v22 = vsel %vm4591_vm10, %v1686_v4, %v1641_v62  ;;  %vm4603_vm10 = vmmov %vm4590_vm3 }
 0x377   : > { %v1583_v38 = vpop.permute.xlu1 %1582 }
 0x378   : > { %v1581_v12 = vpop.permute.xlu0 %1580  ;;  %v1689_v59 = vsel %vm4601_vm8, %v3979_v56, %v1583_v38  ;;  %vm4612_vm8 = vmmov %vm4589_vm2 }
 0x379   : > { %v1688_v46 = vsel %vm4596_vm6, %v1496_v48, %v1581_v12  ;;  %vm4607_vm6 = vmmov %vm4589_vm2  ;;  %v2260_v48 = vld [vmem:[%s4403_s3 + $0x40] sm:$0xff] }
 0x37b   : > { %v1639_v26 = vpop.permute.xlu1 %1638 }
 0x37c   : > { %v1701_v31 = vsel %vm4590_vm3, %v1685_v55, %v1639_v26  ;;  %v1645_v33 = vpop.permute.xlu0 %1644  ;;  %v2254_v55 = vld [vmem:[%s4403_s3 + $0x10] sm:$0xff]  ;;  %v2255_v26 = vld [vmem:[%s4403_s3 + $0x18] sm:$0xff] }
 0x37d   : > { %2733 = vmatmul.mubr.msk.f32.vlgmr.msra.gmra.mrb[12].mxu0 %vm4592_vm0, %v1701_v31  ;;  %v1704_v16 = vsel %vm4598_vm13, %v1688_v46, %v1645_v33  ;;  %vm4609_vm13 = vmmov %vm4590_vm3  ;;  %v2867_v4 = vpack.c.bf16 %v2255_v26, %v2254_v55  ;;  %v2256_v31 = vld [vmem:[%s4403_s3 + $0x20] sm:$0xff]  ;;  %v2257_v33 = vld [vmem:[%s4403_s3 + $0x28] sm:$0xff] }
 0x37e   : > { %2735 = vmatprep.mubr.msk.f32.mxu0 %vm4593_vm4, %v1702_v22  ;;  %vm4604_vm4 = vmmov %vm4592_vm0  ;;  %v2870_v22 = vpack.c.bf16 %v2257_v33, %v2256_v31 }
 0x37f   : > { %v1587_v39 = vpop.permute.xlu1 %1586 }
 0x380   : > { %v1585_v23 = vpop.permute.xlu0 %1584  ;;  %v1691_v56 = vsel %vm4605_vm12, %v3999_v18, %v1587_v39  ;;  %vm4616_vm12 = vmmov %vm4589_vm2  ;;  %v2258_v39 = vld [vmem:[%s4403_s3 + $0x30] sm:$0xff] }
 0x381   : > { %v1690_v3 = vsel %vm4589_vm2, %v1498_v61, %v1585_v23  ;;  %v2259_v23 = vld [vmem:[%s4403_s3 + $0x38] sm:$0xff]  ;;  %v4225_v61 = vld [vmem:[%s4402_s2 + $0x2] ss:$0 sm:$0xff] }
 0x383   : > { %v1643_v24 = vpop.permute.xlu1 %1642 }
 0x384   : > { %v1703_v53 = vsel %vm4597_vm9, %v1687_v29, %v1643_v24  ;;  %v1649_v42 = vpop.permute.xlu0 %1648  ;;  %vm4608_vm9 = vmmov %vm4590_vm3  ;;  %v2873_v29 = vpack.c.bf16 %v2259_v23, %v2258_v39  ;;  %v2261_v24 = vld [vmem:[%s4403_s3 + $0x48] sm:$0xff] }
 0x385   : > { %2736 = vmatmul.mubr.msk.f32.gmra.mrb[14].mxu0 %vm4599_vm7, %v1703_v53  ;;  %v1706_v13 = vsel %vm4603_vm10, %v1690_v3, %v1649_v42  ;;  %vm4610_vm7 = vmmov %vm4592_vm0  ;;  %v2876_v46 = vpack.c.bf16 %v2261_v24, %v2260_v48  ;;  %v2262_v53 = vld [vmem:[%s4403_s3 + $0x50] sm:$0xff]  ;;  %v2263_v42 = vld [vmem:[%s4403_s3 + $0x58] sm:$0xff] }
 0x386   : > { %2738 = vmatprep.mubr.msk.f32.mxu0 %vm4600_vm15, %v1704_v16  ;;  %vm4611_vm15 = vmmov %vm4592_vm0  ;;  %v2879_v16 = vpack.c.bf16 %v2263_v42, %v2262_v53 }
 0x387   : > { %v1591_v0 = vpop.permute.xlu1 %1590  ;;  %vm4614_vm10 = vmmov %vm4590_vm3 }
 0x388   : > { %v1589_v35 = vpop.permute.xlu0 %1588  ;;  %v1693_v18 = vsel %vm4612_vm8, %v4021_v28, %v1591_v0  ;;  %vm4624_vm8 = vmmov %vm4590_vm3  ;;  %v2264_v0 = vld [vmem:[%s4403_s3 + $0x60] sm:$0xff] }
 0x389   : > { %v1692_v41 = vsel %vm4607_vm6, %v1500_v15, %v1589_v35  ;;  %vm4618_vm6 = vmmov %vm4590_vm3  ;;  %v2265_v35 = vld [vmem:[%s4403_s3 + $0x68] sm:$0xff] }
 0x38b   : > { %v1647_v11 = vpop.permute.xlu1 %1646 }
 0x38c   : > { %v1705_v36 = vsel %vm4590_vm3, %v1689_v59, %v1647_v11  ;;  %v1653_v54 = vpop.permute.xlu0 %1652  ;;  %v2882_v59 = vpack.c.bf16 %v2265_v35, %v2264_v0 }
 0x38d   : > { %2739 = vmatmul.mubr.msk.f32.gmra.mrb[16].mxu0 %vm4592_vm0, %v1705_v36  ;;  %v1708_v30 = vsel %vm4609_vm13, %v1692_v41, %v1653_v54  ;;  %vm4620_vm13 = vmmov %vm4592_vm0 }
 0x38e   : > { %2741 = vmatprep.mubr.msk.f32.mxu0 %vm4604_vm4, %v1706_v13  ;;  %vm4615_vm4 = vmmov %vm4592_vm0 }
 0x38f   : > { %v1595_v8 = vpop.permute.xlu1 %1594 }
 0x390   : > { %v1593_v37 = vpop.permute.xlu0 %1592  ;;  %v1695_v28 = vsel %vm4616_vm12, %v4039_v57, %v1595_v8  ;;  %vm2003_vm12 = vcmask 261124  }
 0x391   : > { %v1694_v10 = vsel %vm4589_vm2, %v1502_v34, %v1593_v37  ;;  %vm4626_vm2 = vmmov %vm4592_vm0 }
 0x393   : > { %v1651_v7 = vpop.permute.xlu1 %1650 }
 0x394   : > { %v1707_v60 = vsel %vm4608_vm9, %v1691_v56, %v1651_v7  ;;  %v1657_v19 = vpop.permute.xlu0 %1656  ;;  %vm4619_vm9 = vmmov %vm4590_vm3 }
 0x395   : > { %2742 = vmatmul.mubr.msk.f32.gmra.mrb[18].mxu0 %vm4610_vm7, %v1707_v60  ;;  %v1710_v32 = vsel %vm4614_vm10, %v1694_v10, %v1657_v19  ;;  %vm4621_vm7 = vmmov %vm4592_vm0 }
 0x396   : > { %2744 = vmatprep.mubr.msk.f32.mxu0 %vm4611_vm15, %v1708_v30  ;;  %vm4622_vm15 = vmmov %vm4617_vm1 }
 0x397   : > { %v1599_v21 = vpop.permute.xlu1 %1598  ;;  %vm4628_vm10 = vmmov %vm4617_vm1 }
 0x398   : > { %v1597_v49 = vpop.permute.xlu0 %1596  ;;  %v1697_v25 = vsel %vm4622_vm15, %v4057_v9, %v1599_v21  ;;  %vm2190_vm15 = vcmask 1046534  }
 0x399   : > { %v1696_v47 = vsel %vm4617_vm1, %v1504_v45, %v1597_v49  ;;  %vm2180_vm1 = vcmask 1041409  }
 0x39b   : > { %v1655_v14 = vpop.permute.xlu1 %1654 }
 0x39c   : > { %v1709_v43 = vsel %vm4590_vm3, %v1693_v18, %v1655_v14  ;;  %v1661_v6 = vpop.permute.xlu0 %1660  ;;  %vm4627_vm3 = vmmov %vm4592_vm0 }
 0x39d   : > { %2745 = vmatmul.mubr.msk.f32.gmra.mrb[20].mxu0 %vm4592_vm0, %v1709_v43  ;;  %v1712_v27 = vsel %vm4619_vm9, %v1696_v47, %v1661_v6  ;;  %vm4629_vm0 = vmmov %vm4625_vm5  ;;  %vm2184_vm9 = vcmask 1043459  }
 0x39e   : > { %2747 = vmatprep.mubr.msk.f32.mxu0 %vm4615_vm4, %v1710_v32  ;;  %vm4630_vm4 = vmmov %vm4626_vm2 }
 0x39f   : > { %v1603_v51 = vpop.permute.xlu1 %1602 }
 0x3a0   : > { %v1601_v58 = vpop.permute.xlu0 %1600  ;;  %v1699_v38 = vsel %vm4628_vm10, %v4079_v5, %v1603_v51  ;;  %v2864_v5 = vpack.c.bf16 %v2253_v17, %v2252_v50 }
 0x3a1   : > { %v1698_v40 = vsel %vm4623_vm14, %v1506_v1, %v1601_v58  ;;  %vm2192_vm14 = vcmask 1047559  }
 0x3a2   : > { %2865 = vmatpush3.bf16.msra.mxu1 %v2864_v5 }
 0x3a3   : > { %v1659_v44 = vpop.permute.xlu1 %1658  ;;  %2866 = vmatprep.subr.bf16.mxu1 %v3010_v20 }
 0x3a4   : > { %v1711_v2 = vsel %vm4618_vm6, %v1695_v28, %v1659_v44  ;;  %v1665_v63 = vpop.permute.xlu0 %1664  ;;  %vm2182_vm6 = vcmask 1042434  }
 0x3a5   : > { %2748 = vmatmul.mubr.msk.f32.gmra.mrb[22].mxu0 %vm4620_vm13, %v1711_v2  ;;  %v1714_v62 = vsel %vm4625_vm5, %v1698_v40, %v1665_v63  ;;  %vm2186_vm13 = vcmask 1044484   ;;  %vm4631_vm5 = vmmov %vm4628_vm10 }
 0x3a6   : > { %2750 = vmatprep.mubr.msk.f32.mxu0 %vm4621_vm7, %v1712_v27  ;;  %2868 = vmatpush3.bf16.msra.mxu1 %v2867_v4  ;;  %vm2188_vm7 = vcmask 1045509  }
 0x3a7   : > { %v1663_v57 = vpop.permute.xlu1 %1662  ;;  %2869 = vmatprep.subr.bf16.mxu1 %v3010_v20 }
 0x3a8   : > { %v1713_v52 = vsel %vm4624_vm8, %v1697_v25, %v1663_v57  ;;  %vm3011_vm8 = vmmov 0  }
 0x3a9   : > { %2751 = vmatmul.mubr.msk.f32.gmra.mrb[24].mxu0 %vm4626_vm2, %v1713_v52  ;;  %vm4632_vm2 = vmmov %vm4629_vm0 }
 0x3aa   : > { %2753 = vmatprep.mubr.msk.f32.mxu0 %vm4627_vm3, %v1714_v62  ;;  %2871 = vmatpush3.bf16.msra.mxu1 %v2870_v22 }
 0x3ab   : > { %v1667_v12 = vpop.permute.xlu1 %1666  ;;  %2872 = vmatprep.subr.bf16.mxu1 %v3010_v20 }
 0x3ac   : > { %v1715_v9 = vsel %vm4629_vm0, %v1699_v38, %v1667_v12 }
 0x3ad   : > { %2754 = vmatmul.mubr.msk.f32.gmra.mrb[26].mxu0 %vm4630_vm4, %v1715_v9 }
 0x3ae   : > { %2874 = vmatpush3.bf16.msra.mxu1 %v2873_v29 }
 0x3af   : > { %2875 = vmatprep.subr.bf16.mxu1 %v3010_v20 }
 0x3b2   : > { %2877 = vmatpush3.bf16.msra.mxu1 %v2876_v46 }
 0x3b3   : > { %2878 = vmatprep.subr.bf16.mxu1 %v3010_v20 }
 0x3b6   : > { %2880 = vmatpush3.bf16.msra.mxu1 %v2879_v16 }
 0x3b7   : > { %2881 = vmatprep.subr.bf16.mxu1 %v3010_v20 }
 0x3ba   : > { %2883 = vmatpush3.bf16.msra.mxu1 %v2882_v59 }
 0x3bb   : > { %2884 = vmatprep.subr.bf16.mxu1 %v3010_v20 }
 0x450   : > { %v2734_v11 = vpop.f32.mrb[12].mxu0 }
 0x451   : > { %v1857_v3 = vadd.f32 %v2734_v11, %v4225_v61  ;;  %v1851_v36 = vpop.f32.mrb[13].mxu0 }
 0x452   : > { %v1852_v54 = vadd.f32 %v4225_v61, %v1851_v36 }
 0x453   : > { %v1931_v13 = vmax.f32 %v1857_v3, 0.0 }
 0x454   : > { %v1930_v8 = vmax.f32 %v1852_v54, 0.0 }
 0x455   : > { %v2060_v37 = vsel %vm1946_vm11, %v1931_v13, -inf  ;;  %v2116_v56 = vsel %vm2003_vm12, %v1931_v13, -inf }
 0x456   : > { %v2061_v15 = vrot.slane %v2060_v37, 4  ;;  %v2117_v7 = vrot.slane %v2116_v56, 4  ;;  %v1947_v41 = vsel %vm1946_vm11, %v1930_v8, -inf  ;;  %v2004_v60 = vsel %vm2003_vm12, %v1930_v8, -inf }
 0x457   : > { %v1948_v19 = vrot.slane %v1947_v41, 4  ;;  %v2005_v30 = vrot.slane %v2004_v60, 4 }
 0x458   : > { %v2062_v21 = vmax.f32 %v2060_v37, %v2061_v15  ;;  %v2118_v49 = vmax.f32 %v2116_v56, %v2117_v7  ;;  %v2737_v18 = vpop.f32.mrb[14].mxu0 }
 0x459   : > { %v1949_v34 = vmax.f32 %v1947_v41, %v1948_v19  ;;  %v2006_v14 = vmax.f32 %v2004_v60, %v2005_v30  ;;  %v1867_v10 = vadd.f32 %v2737_v18, %v4225_v61  ;;  %v1861_v43 = vpop.f32.mrb[15].mxu0 }
 0x45a   : > { %v2063_v6 = vrot.slane %v2062_v21, 2  ;;  %v2119_v32 = vrot.slane %v2118_v49, 2  ;;  %v1862_v51 = vadd.f32 %v4225_v61, %v1861_v43 }
 0x45b   : > { %v1950_v58 = vrot.slane %v1949_v34, 2  ;;  %v2007_v28 = vrot.slane %v2006_v14, 2  ;;  %v1933_v45 = vmax.f32 %v1867_v10, 0.0 }
 0x45c   : > { %v2064_v44 = vmax.f32 %v2062_v21, %v2063_v6  ;;  %v2120_v47 = vmax.f32 %v2118_v49, %v2119_v32  ;;  %v1932_v2 = vmax.f32 %v1862_v51, 0.0 }
 0x45d   : > { %v1951_v27 = vmax.f32 %v1949_v34, %v1950_v58  ;;  %v2008_v63 = vmax.f32 %v2006_v14, %v2007_v28  ;;  %v2067_v25 = vsel %vm1946_vm11, %v1933_v45, -inf  ;;  %v2123_v1 = vsel %vm2003_vm12, %v1933_v45, -inf }
 0x45e   : > { %v2068_v57 = vrot.slane %v2067_v25, 4  ;;  %v2124_v40 = vrot.slane %v2123_v1, 4  ;;  %v2065_v52 = vrot.slane %v2064_v44, 1  ;;  %v2121_v62 = vrot.slane %v2120_v47, 1 }
 0x45f   : > { %v1954_v38 = vsel %vm1946_vm11, %v1932_v2, -inf  ;;  %v2011_v12 = vsel %vm2003_vm12, %v1932_v2, -inf  ;;  %v1952_v55 = vrot.slane %v1951_v27, 1  ;;  %v2009_v20 = vrot.slane %v2008_v63, 1 }
 0x460   : > { %v2069_v9 = vmax.f32 %v2067_v25, %v2068_v57  ;;  %v2125_v50 = vmax.f32 %v2123_v1, %v2124_v40  ;;  %v2740_v17 = vpop.f32.mrb[16].mxu0  ;;  %v1955_v5 = vrot.slane %v1954_v38, 4  ;;  %v2012_v26 = vrot.slane %v2011_v12, 4 }
 0x461   : > { %v1871_v4 = vpop.f32.mrb[17].mxu0  ;;  %v1877_v22 = vadd.f32 %v2740_v17, %v4225_v61  ;;  %v2066_v23 = vmax.f32 %v2064_v44, %v2065_v52  ;;  %v2122_v29 = vmax.f32 %v2120_v47, %v2121_v62  ;;  %v1953_v0 = vmax.f32 %v1951_v27, %v1952_v55 }
 0x462   : > { %v2070_v31 = vrot.slane %v2069_v9, 2  ;;  %v2126_v33 = vrot.slane %v2125_v50, 2  ;;  %v1872_v39 = vadd.f32 %v4225_v61, %v1871_v4  ;;  %v1956_v48 = vmax.f32 %v1954_v38, %v1955_v5 }
 0x463   : > { %v2013_v24 = vmax.f32 %v2011_v12, %v2012_v26  ;;  %v1935_v42 = vmax.f32 %v1877_v22, 0.0  ;;  %v2010_v35 = vmax.f32 %v2008_v63, %v2009_v20 }
 0x464   : > { %v2071_v46 = vmax.f32 %v2069_v9, %v2070_v31  ;;  %v2127_v53 = vmax.f32 %v2125_v50, %v2126_v33  ;;  %v1934_v16 = vmax.f32 %v1872_v39, 0.0  ;;  %v1957_v59 = vrot.slane %v1956_v48, 2 }
 0x465   : > { %v2014_v11 = vrot.slane %v2013_v24, 2  ;;  %v2074_v54 = vsel %vm1946_vm11, %v1935_v42, -inf  ;;  %v2130_v13 = vsel %vm2003_vm12, %v1935_v42, -inf }
 0x466   : > { %v2072_v3 = vrot.slane %v2071_v46, 1  ;;  %v2128_v36 = vrot.slane %v2127_v53, 1  ;;  %v1958_v8 = vmax.f32 %v1956_v48, %v1957_v59  ;;  %v2075_v56 = vrot.slane %v2074_v54, 4 }
 0x467   : > { %v2015_v37 = vmax.f32 %v2013_v24, %v2014_v11  ;;  %v2131_v15 = vrot.slane %v2130_v13, 4  ;;  %v1961_v60 = vsel %vm1946_vm11, %v1934_v16, -inf  ;;  %v2018_v19 = vsel %vm2003_vm12, %v1934_v16, -inf }
 0x468   : > { %v2073_v7 = vmax.f32 %v2071_v46, %v2072_v3  ;;  %v2129_v41 = vmax.f32 %v2127_v53, %v2128_v36  ;;  %v2743_v30 = vpop.f32.mrb[18].mxu0  ;;  %v1959_v21 = vrot.slane %v1958_v8, 1  ;;  %v2076_v18 = vmax.f32 %v2074_v54, %v2075_v56 }
 0x469   : > { %v2016_v49 = vrot.slane %v2015_v37, 1  ;;  %v2132_v34 = vmax.f32 %v2130_v13, %v2131_v15  ;;  %v1881_v14 = vpop.f32.mrb[19].mxu0  ;;  %v1962_v6 = vrot.slane %v1961_v60, 4  ;;  %v2019_v32 = vrot.slane %v2018_v19, 4 }
 0x46a   : > { %v2221_v10 = vsel %vm2180_vm1, %v2073_v7, %v2066_v23  ;;  %v2239_v43 = vsel %vm2180_vm1, %v2129_v41, %v2122_v29  ;;  %v1960_v51 = vmax.f32 %v1958_v8, %v1959_v21  ;;  %v2077_v28 = vrot.slane %v2076_v18, 2 }
 0x46b   : > { %v2017_v58 = vmax.f32 %v2015_v37, %v2016_v49  ;;  %v2133_v45 = vrot.slane %v2132_v34, 2  ;;  %v1963_v44 = vmax.f32 %v1961_v60, %v1962_v6  ;;  %v2020_v47 = vmax.f32 %v2018_v19, %v2019_v32 }
 0x46c   : > { %v1887_v2 = vadd.f32 %v2743_v30, %v4225_v61  ;;  %v1882_v27 = vadd.f32 %v4225_v61, %v1881_v14  ;;  %v2181_v63 = vsel %vm2180_vm1, %v1960_v51, %v1953_v0  ;;  %v2078_v1 = vmax.f32 %v2076_v18, %v2077_v28 }
 0x46d   : > { %v2203_v25 = vsel %vm2180_vm1, %v2017_v58, %v2010_v35  ;;  %v2134_v57 = vmax.f32 %v2132_v34, %v2133_v45  ;;  %v1964_v40 = vrot.slane %v1963_v44, 2  ;;  %v2021_v52 = vrot.slane %v2020_v47, 2 }
 0x46e   : > { %v1937_v62 = vmax.f32 %v1887_v2, 0.0  ;;  %v1936_v38 = vmax.f32 %v1882_v27, 0.0  ;;  %v2079_v12 = vrot.slane %v2078_v1, 1 }
 0x46f   : > { %v2135_v9 = vrot.slane %v2134_v57, 1  ;;  %v1965_v50 = vmax.f32 %v1963_v44, %v1964_v40  ;;  %v2022_v17 = vmax.f32 %v2020_v47, %v2021_v52 }
 0x470   : > { %v2081_v55 = vsel %vm1946_vm11, %v1937_v62, -inf  ;;  %v2137_v20 = vsel %vm2003_vm12, %v1937_v62, -inf  ;;  %v2746_v5 = vpop.f32.mrb[20].mxu0  ;;  %v2080_v26 = vmax.f32 %v2078_v1, %v2079_v12  ;;  %v1968_v29 = vsel %vm1946_vm11, %v1936_v38, -inf }
 0x471   : > { %v2136_v4 = vmax.f32 %v2134_v57, %v2135_v9  ;;  %v2082_v31 = vrot.slane %v2081_v55, 4  ;;  %v2138_v33 = vrot.slane %v2137_v20, 4  ;;  %v1891_v22 = vpop.f32.mrb[21].mxu0  ;;  %v1966_v39 = vrot.slane %v1965_v50, 1 }
 0x472   : > { %v2023_v23 = vrot.slane %v2022_v17, 1  ;;  %v2025_v48 = vsel %vm2003_vm12, %v1936_v38, -inf  ;;  %v4256_v24 = vsel %vm2182_vm6, %v2080_v26, %v2221_v10  ;;  %v1969_v35 = vrot.slane %v1968_v29, 4 }
 0x473   : > { %v4259_v46 = vsel %vm2182_vm6, %v2136_v4, %v2239_v43  ;;  %v2083_v53 = vmax.f32 %v2081_v55, %v2082_v31  ;;  %v2139_v42 = vmax.f32 %v2137_v20, %v2138_v33  ;;  %v1967_v16 = vmax.f32 %v1965_v50, %v1966_v39 }
 0x474   : > { %v2024_v0 = vmax.f32 %v2022_v17, %v2023_v23  ;;  %v2026_v59 = vrot.slane %v2025_v48, 4  ;;  %v1897_v36 = vadd.f32 %v2746_v5, %v4225_v61  ;;  %v1892_v54 = vadd.f32 %v4225_v61, %v1891_v22 }
 0x475   : > { %v2084_v11 = vrot.slane %v2083_v53, 2  ;;  %v2140_v3 = vrot.slane %v2139_v42, 2  ;;  %v2183_v13 = vsel %vm2182_vm6, %v1967_v16, %v2181_v63  ;;  %v1970_v37 = vmax.f32 %v1968_v29, %v1969_v35 }
 0x476   : > { %v4265_v8 = vsel %vm2182_vm6, %v2024_v0, %v2203_v25  ;;  %v2027_v56 = vmax.f32 %v2025_v48, %v2026_v59  ;;  %v1939_v41 = vmax.f32 %v1897_v36, 0.0  ;;  %v1938_v60 = vmax.f32 %v1892_v54, 0.0 }
 0x477   : > { %v2085_v15 = vmax.f32 %v2083_v53, %v2084_v11  ;;  %v2141_v7 = vmax.f32 %v2139_v42, %v2140_v3  ;;  %v1971_v19 = vrot.slane %v1970_v37, 2 }
 0x478   : > { %v2028_v30 = vrot.slane %v2027_v56, 2  ;;  %v2749_v21 = vpop.f32.mrb[22].mxu0  ;;  %v2088_v34 = vsel %vm1946_vm11, %v1939_v41, -inf  ;;  %v2144_v14 = vsel %vm2003_vm12, %v1939_v41, -inf  ;;  %v1975_v45 = vsel %vm1946_vm11, %v1938_v60, -inf }
 0x479   : > { %v2086_v49 = vrot.slane %v2085_v15, 1  ;;  %v2142_v18 = vrot.slane %v2141_v7, 1  ;;  %v1901_v10 = vpop.f32.mrb[23].mxu0  ;;  %v1972_v43 = vmax.f32 %v1970_v37, %v1971_v19  ;;  %v2089_v32 = vrot.slane %v2088_v34, 4 }
 0x47a   : > { %v2029_v6 = vmax.f32 %v2027_v56, %v2028_v30  ;;  %v2145_v51 = vrot.slane %v2144_v14, 4  ;;  %v2032_v44 = vsel %vm2003_vm12, %v1938_v60, -inf  ;;  %v1976_v1 = vrot.slane %v1975_v45, 4 }
 0x47b   : > { %v4269_v58 = vmax.f32 %v2085_v15, %v2086_v49  ;;  %v4271_v28 = vmax.f32 %v2141_v7, %v2142_v18  ;;  %v1973_v47 = vrot.slane %v1972_v43, 1  ;;  %v2090_v27 = vmax.f32 %v2088_v34, %v2089_v32 }
 0x47c   : > { %v2030_v2 = vrot.slane %v2029_v6, 1  ;;  %v2146_v63 = vmax.f32 %v2144_v14, %v2145_v51  ;;  %v2752_v25 = vpop.f32.mrb[24].mxu0  ;;  %v2033_v57 = vrot.slane %v2032_v44, 4  ;;  %v1907_v40 = vadd.f32 %v2749_v21, %v4225_v61 }
 0x47d   : > { %v1902_v52 = vadd.f32 %v4225_v61, %v1901_v10  ;;  %v1911_v62 = vpop.f32.mrb[25].mxu0  ;;  %v1974_v38 = vmax.f32 %v1972_v43, %v1973_v47  ;;  %v2091_v9 = vrot.slane %v2090_v27, 2  ;;  %v1977_v17 = vmax.f32 %v1975_v45, %v1976_v1 }
 0x47e   : > { %v4277_v12 = vmax.f32 %v2029_v6, %v2030_v2  ;;  %v2147_v50 = vrot.slane %v2146_v63, 2  ;;  %v2034_v55 = vmax.f32 %v2032_v44, %v2033_v57  ;;  %v1941_v20 = vmax.f32 %v1907_v40, 0.0 }
 0x47f   : > { %v1940_v5 = vmax.f32 %v1902_v52, 0.0  ;;  %v4280_v26 = vsel %vm2184_vm9, %v1974_v38, %v2183_v13  ;;  %v2092_v4 = vmax.f32 %v2090_v27, %v2091_v9  ;;  %v1917_v33 = vadd.f32 %v2752_v25, %v4225_v61 }
 0x480   : > { %v2148_v31 = vmax.f32 %v2146_v63, %v2147_v50  ;;  %v2755_v22 = vpop.f32.mrb[26].mxu0  ;;  %v1978_v39 = vrot.slane %v1977_v17, 2  ;;  %v2035_v23 = vrot.slane %v2034_v55, 2  ;;  %v2095_v29 = vsel %vm1946_vm11, %v1941_v20, -inf }
 0x481   : > { %v2151_v48 = vsel %vm2003_vm12, %v1941_v20, -inf  ;;  %v1921_v53 = vpop.f32.mrb[27].mxu0  ;;  %v2093_v42 = vrot.slane %v2092_v4, 1  ;;  %v2096_v0 = vrot.slane %v2095_v29, 4  ;;  %v1982_v3 = vsel %vm1946_vm11, %v1940_v5, -inf }
 0x482   : > { %v2149_v16 = vrot.slane %v2148_v31, 1  ;;  %v2152_v35 = vrot.slane %v2151_v48, 4  ;;  %v1979_v59 = vmax.f32 %v1977_v17, %v1978_v39  ;;  %v2036_v11 = vmax.f32 %v2034_v55, %v2035_v23 }
 0x483   : > { %v2039_v36 = vsel %vm2003_vm12, %v1940_v5, -inf  ;;  %v4287_v54 = vmax.f32 %v2092_v4, %v2093_v42  ;;  %v2097_v37 = vmax.f32 %v2095_v29, %v2096_v0  ;;  %v1983_v41 = vrot.slane %v1982_v3, 4 }
 0x484   : > { %v4289_v13 = vmax.f32 %v2148_v31, %v2149_v16  ;;  %v2153_v56 = vmax.f32 %v2151_v48, %v2152_v35  ;;  %v1980_v15 = vrot.slane %v1979_v59, 1  ;;  %v2037_v7 = vrot.slane %v2036_v11, 1 }
 0x485   : > { %v2040_v60 = vrot.slane %v2039_v36, 4  ;;  %v2098_v19 = vrot.slane %v2097_v37, 2  ;;  %v1943_v21 = vmax.f32 %v1917_v33, 0.0  ;;  %v1912_v49 = vadd.f32 %v4225_v61, %v1911_v62 }
 0x486   : > { %v2154_v30 = vrot.slane %v2153_v56, 2  ;;  %v4292_v18 = vmax.f32 %v1979_v59, %v1980_v15  ;;  %v4294_v34 = vmax.f32 %v2036_v11, %v2037_v7  ;;  %v1984_v14 = vmax.f32 %v1982_v3, %v1983_v41 }
 0x487   : > { %v2041_v10 = vmax.f32 %v2039_v36, %v2040_v60  ;;  %v2099_v43 = vmax.f32 %v2097_v37, %v2098_v19  ;;  %v2102_v32 = vsel %vm1946_vm11, %v1943_v21, -inf  ;;  %v2158_v51 = vsel %vm2003_vm12, %v1943_v21, -inf }
 0x488   : > { %v2155_v6 = vmax.f32 %v2153_v56, %v2154_v30  ;;  %v1985_v45 = vrot.slane %v1984_v14, 2  ;;  %v2103_v47 = vrot.slane %v2102_v32, 4  ;;  %v2159_v2 = vrot.slane %v2158_v51, 4 }
 0x489   : > { %v2042_v44 = vrot.slane %v2041_v10, 2  ;;  %v2100_v27 = vrot.slane %v2099_v43, 1  ;;  %v1942_v25 = vmax.f32 %v1912_v49, 0.0  ;;  %v1927_v1 = vadd.f32 %v2755_v22, %v4225_v61 }
 0x48a   : > { %v2156_v63 = vrot.slane %v2155_v6, 1  ;;  %v1986_v57 = vmax.f32 %v1984_v14, %v1985_v45  ;;  %v2104_v52 = vmax.f32 %v2102_v32, %v2103_v47  ;;  %v2160_v62 = vmax.f32 %v2158_v51, %v2159_v2 }
 0x48b   : > { %v2043_v40 = vmax.f32 %v2041_v10, %v2042_v44  ;;  %v2101_v38 = vmax.f32 %v2099_v43, %v2100_v27  ;;  %v1989_v50 = vsel %vm1946_vm11, %v1942_v25, -inf  ;;  %v2046_v17 = vsel %vm2003_vm12, %v1942_v25, -inf }
 0x48c   : > { %v4299_v9 = vmax.f32 %v2155_v6, %v2156_v63  ;;  %v1987_v55 = vrot.slane %v1986_v57, 1  ;;  %v2105_v5 = vrot.slane %v2104_v52, 2  ;;  %v2161_v4 = vrot.slane %v2160_v62, 2 }
 0x48d   : > { %v2044_v20 = vrot.slane %v2043_v40, 1  ;;  %v1990_v31 = vrot.slane %v1989_v50, 4  ;;  %v2047_v33 = vrot.slane %v2046_v17, 4  ;;  %v1945_v22 = vmax.f32 %v1927_v1, 0.0 }
 0x48e   : > { %v1922_v39 = vadd.f32 %v4225_v61, %v1921_v53  ;;  %v1988_v23 = vmax.f32 %v1986_v57, %v1987_v55  ;;  %v2106_v48 = vmax.f32 %v2104_v52, %v2105_v5  ;;  %v2162_v42 = vmax.f32 %v2160_v62, %v2161_v4 }
 0x48f   : > { %v2045_v29 = vmax.f32 %v2043_v40, %v2044_v20  ;;  %v1991_v16 = vmax.f32 %v1989_v50, %v1990_v31  ;;  %v2048_v0 = vmax.f32 %v2046_v17, %v2047_v33  ;;  %v2109_v35 = vsel %vm1946_vm11, %v1945_v22, -inf }
 0x490   : > { %v2165_v59 = vsel %vm2003_vm12, %v1945_v22, -inf  ;;  %v2107_v11 = vrot.slane %v2106_v48, 1  ;;  %v2163_v3 = vrot.slane %v2162_v42, 1  ;;  %v2110_v36 = vrot.slane %v2109_v35, 4 }
 0x491   : > { %v2166_v37 = vrot.slane %v2165_v59, 4  ;;  %v1992_v56 = vrot.slane %v1991_v16, 2  ;;  %v2049_v15 = vrot.slane %v2048_v0, 2  ;;  %v1944_v7 = vmax.f32 %v1922_v39, 0.0 }
 0x492   : > { %v2223_v61 = vsel %vm2184_vm9, %v4269_v58, %v4256_v24  ;;  %v2108_v53 = vmax.f32 %v2106_v48, %v2107_v11  ;;  %v2164_v41 = vmax.f32 %v2162_v42, %v2163_v3  ;;  %v2111_v60 = vmax.f32 %v2109_v35, %v2110_v36 }
 0x493   : > { %v2167_v19 = vmax.f32 %v2165_v59, %v2166_v37  ;;  %v1993_v30 = vmax.f32 %v1991_v16, %v1992_v56  ;;  %v2050_v21 = vmax.f32 %v2048_v0, %v2049_v15  ;;  %v1996_v49 = vsel %vm1946_vm11, %v1944_v7, -inf  ;;  %v2505_v56 = vld [vmem:[%s4404_s4] ss:$0 sm:$0xff] }
 0x494   : > { %v2053_v14 = vsel %vm2003_vm12, %v1944_v7, -inf  ;;  %v2112_v10 = vrot.slane %v2111_v60, 2  ;;  %v1997_v6 = vrot.slane %v1996_v49, 4  ;;  %v2224_v44 = vsel %vm2186_vm13, %v4287_v54, %v2223_v61  ;;  %v2266_v54 = vld [vmem:[%s4403_s3 + $0x70] sm:$0xff] }
 0x495   : > { %v2168_v43 = vrot.slane %v2167_v19, 2  ;;  %v2054_v32 = vrot.slane %v2053_v14, 4  ;;  %v1994_v51 = vrot.slane %v1993_v30, 1  ;;  %v2051_v45 = vrot.slane %v2050_v21, 1 }
 0x496   : > { %v2205_v24 = vsel %vm2184_vm9, %v4277_v12, %v4265_v8  ;;  %v2113_v58 = vmax.f32 %v2111_v60, %v2112_v10  ;;  %v1998_v2 = vmax.f32 %v1996_v49, %v1997_v6  ;;  %v2225_v1 = vsel %vm2188_vm7, %v2101_v38, %v2224_v44  ;;  %v2267_v8 = vld [vmem:[%s4403_s3 + $0x78] sm:$0xff] }
 0x497   : > { %v2169_v47 = vmax.f32 %v2167_v19, %v2168_v43  ;;  %v2055_v27 = vmax.f32 %v2053_v14, %v2054_v32  ;;  %v1995_v63 = vmax.f32 %v1993_v30, %v1994_v51  ;;  %v2052_v25 = vmax.f32 %v2050_v21, %v2051_v45 }
 0x498   : > { %v2206_v57 = vsel %vm2186_vm13, %v4294_v34, %v2205_v24  ;;  %v2114_v40 = vrot.slane %v2113_v58, 1  ;;  %v1999_v62 = vrot.slane %v1998_v2, 2  ;;  %v2226_v12 = vsel %vm2190_vm15, %v2108_v53, %v2225_v1 }
 0x499   : > { %v2170_v52 = vrot.slane %v2169_v47, 1  ;;  %v2056_v50 = vrot.slane %v2055_v27, 2  ;;  %v2207_v17 = vsel %vm2188_vm7, %v2045_v29, %v2206_v57  ;;  %v2241_v34 = vsel %vm2184_vm9, %v4271_v28, %v4259_v46 }
 0x49a   : > { %v2187_v38 = vsel %vm2186_vm13, %v4292_v18, %v4280_v26  ;;  %v2000_v55 = vmax.f32 %v1998_v2, %v1999_v62  ;;  %v2115_v5 = vmax.f32 %v2113_v58, %v2114_v40  ;;  %v2208_v4 = vsel %vm2190_vm15, %v2052_v25, %v2207_v17 }
 0x49b   : > { %v2057_v20 = vmax.f32 %v2055_v27, %v2056_v50  ;;  %v2171_v31 = vmax.f32 %v2169_v47, %v2170_v52  ;;  %v2242_v33 = vsel %vm2186_vm13, %v4289_v13, %v2241_v34  ;;  %v2189_v22 = vsel %vm2188_vm7, %v1988_v23, %v2187_v38 }
 0x49c   : > { %v2885_v39 = vpack.c.bf16 %v2267_v8, %v2266_v54  ;;  %v2001_v29 = vrot.slane %v2000_v55, 1  ;;  %v2227_v46 = vsel %vm2192_vm14, %v2115_v5, %v2226_v12  ;;  %v2243_v28 = vsel %vm2188_vm7, %v4299_v9, %v2242_v33 }
 0x49d   : > { %v2058_v48 = vrot.slane %v2057_v20, 1  ;;  %2228 = vrot.lane.b32.xlu1 %v2227_v46, %s3009_s15  ;;  %v2244_v26 = vsel %vm2190_vm15, %v2164_v41, %v2243_v28  ;;  %v2191_v18 = vsel %vm2190_vm15, %v1995_v63, %v2189_v22  ;;  %v3012_v23 = vmov 0.0   ;;  %s3013_s15 = smov 96  }
 0x49e   : > { %2886 = vmatpush3.bf16.msra.mxu1 %v2885_v39  ;;  %v2002_v42 = vmax.f32 %v2000_v55, %v2001_v29  ;;  %v2245_v13 = vsel %vm2192_vm14, %v2171_v31, %v2244_v26  ;;  %2788 = vmatprep.mubr.msk.f32.mxu1 %vm3011_vm8, %v3012_v23 }
 0x49f   : > { %v2059_v16 = vmax.f32 %v2057_v20, %v2058_v48 }
 0x4a0   : > { %v2193_v9 = vsel %vm2192_vm14, %v2002_v42, %v2191_v18 }
 0x4a1   : > { %v2209_v0 = vsel %vm2192_vm14, %v2059_v16, %v2208_v4 }
 0x4a2   : > { %2210 = vrot.lane.b32.xlu0 %v2209_v0, %s3008_s10  ;;  %s2507_s10 = sshll.u32 %s3066_s22, 7  ;;  %s3014_s22 = smov [#allocation2]  }
 0x4a3   : > { %s4358_s16 = scalar_lea.hbm %s4405_s5, %s2507_s10  ;;  %s2948_s25 = sshll.u32 %s3014_s22, 4  ;;  %s2949_s25 = int_to_ptr.vmem [resolvable:$false] %s2948_s25 }
 0x4a4   : > { %s2950_s26 = scalar_lea.vmem %s2949_s25, 256  ;;  %p2951_p0 = scmp.lt.s32.totalorder %s4360_s12, %s2949_s25 }
 0x4a5   : > { %p2952_p1 = scmp.lt.s32.totalorder %s2950_s26, %s2944_s23 }
 0x4a6   : > { %2246 = vrot.lane.b32.xlu0 %v2245_v13, %s3013_s15 }
 0x4a7   : > { %p2953_p2 = por %p2952_p1, %p2951_p0 }
 0x4a9   : > { %p2954_p3 = pnand %p2953_p2, %p2947_p13 }
 0x50f   : > { %v2229_v11 = vpop.permute.xlu1 %2228 }
 0x514   : > { %v2211_v35 = vpop.permute.xlu0 %2210 }
 0x515   : > { %v2249_v59 = vsel %vm4631_vm5, %v2193_v9, %v2211_v35 }
 0x516   : > { %v2250_v36 = vsel %vm4632_vm2, %v2249_v59, %v2229_v11 }
 0x518   : > { %v2247_v3 = vpop.permute.xlu0 %2246 }
 0x519   : > { %v2251_v37 = vsel %vm4627_vm3, %v2250_v36, %v2247_v3 }
 0x51a   : > { %2789 = vmatmul.mubr.f32.vlgmr.msra.gmra.mrb[20].mxu1 %v2251_v37 }
 0x5ed   : > { %v2341_v15 = vpop.f32.mrb[20].mxu1 }
 0x5ee   : > { %v2342_v7 = vadd.f32 %v2505_v56, %v2341_v15  ;;  %v2790_v61 = vpop.f32.mrb[21].mxu1 }
 0x5f0   : > { %v2345_v53 = vmax.f32 %v2342_v7, 0.0 }
 0x5f2   : > { %2346 = vst [vmem:[%s220_s11] sm:$0xff] %v2345_v53 }
 0x5f3   : > { %2957 = shalt.err (!%p2954_p3)
}
 0x5f4   : > { %s2958_s6 = scalar_lea.hbm %s4358_s16, 128  ;;  %s2962_s8 = scalar_lea.hbm %s4405_s5, 256 }
 0x5f5   : > { %p2959_p4 = scmp.ne.s32.totalorder %s4358_s16, %s2958_s6  ;;  %p2963_p9 = scmp.lt.u32.totalorder %s4358_s16, %s4405_s5 }
 0x5f6   : > { %p2964_p10 = scmp.lt.u32.totalorder %s2962_s8, %s2958_s6  ;;  %p2966_p12 = scmp.lt.u32.totalorder %s2958_s6, %s4358_s16 }
 0x5f7   : > { %p2960_p7 = pnand %p2959_p4, %p3083_p5 }
 0x5f8   : > { %p2965_p11 = por %p2964_p10, %p2963_p9 }
 0x5f9   : > { %p2961_p8 = pneg %p2960_p7 }
 0x5fa   : > { %p2967_p13 = por %p2966_p12, %p2965_p11 }
 0x5fc   : > { %p2968_p0 = pnand %p2967_p13, %p2961_p8 }
 0x5fe   : > { %2971 = shalt.err (!%p2968_p0)
}
 0x5ff   : > { %2899 = dma.vmem_to_hbm [thread:$0]  (%p3083_p5), %s4360_s12, 128, %s4358_s16, %s2348_s17  }
 0x600 PF: > { %p2905_p1 = scmp.ge.s32.totalorder %s3006_s21, 2  ;;  %s2373_s10 = sand.u32 1, %s2994_s18  }
 0x601   : > { %s2374_s11 = scalar_lea.sflag [#allocation3], %s2373_s10 }
 0x602   : > { %p2902_p2 = pnand %p2905_p1, %p3087_p6 }
 0x604   : > { %2989 = dma.done.wait (!%p2902_p2), %s2374_s11, 128  }
 0x605   : > { %2991 = vsyncadd (!%p2902_p2), %s2374_s11, 4294967168  ;;  %p15_p3 = scmp.ge.s32.totalorder %s3070_s24, 4   ;;  %s4633_s18 = smov %s2998_s19 }
 0x606   : > { %s4634_s19 = smov %s3002_s20  ;;  %s4635_s20 = smov %s3081_s27 }
 0x607   : > { %s4636_s21 = smov %s3070_s24  ;;  %17 = sbr.rel (!%p15_p3) target bundleno = 3 (0x3), region = 79 }
 0x60e   :  { %2379 = vsyncpa [#allocation3], 1 }
 0x60f   :  { %2381 = vsyncpa [#allocation3 + $0x1], 1 }

</bundles_post_ra>
